<compile_context>
chip_gen: v7x
topology: tpu7x:2x2x1
jax: 0.10.0
libtpu: 0.0.40
codegen_flags: <defaults>
</compile_context>

<pallas_src>
import jax
import jax.numpy as jnp
from jax.experimental import pallas as pl
from jax.experimental.pallas import tpu as pltpu

HIDDEN = 500
HIDDEN_PAD = 512                     # 4 * 128 lanes, unmasked vld/vst
DROPOUT_P = 0.15
INV_KEEP = 1.0 / (1.0 - DROPOUT_P)   # compile-time f32 constant inside kernel


# ---------------------------------------------------------------------------
# Kernel
# ---------------------------------------------------------------------------
def _vae_encoder_kernel(x_ref, w1_ref, b1_ref, w23_ref, b23_ref,
                        mask_ref, eps_ref, z_ref, kl_ref):
    # x_ref:    (TB, D)           f32    flattened input tile (cast to bf16 here)
    # w1_ref:   (D, HIDDEN_PAD)   bf16   linear1 weight, (in, out), zero-padded
    # b1_ref:   (1, HIDDEN_PAD)   f32
    # w23_ref:  (HIDDEN_PAD, 2L)  bf16   [w2^T | w3^T] fused, zero-padded rows
    # b23_ref:  (1, 2L)           f32    [b2 | b3]
    # mask_ref: (TB, HIDDEN_PAD)  int8   raw 0/1 dropout mask (scale applied here)
    # eps_ref:  (TB, L)           f32    N(0,1) reparameterization noise
    # z_ref:    (TB, L)           f32    sampled latent
    # kl_ref:   (TB, 1)           f32    per-row KL partial (summed outside)
    L = eps_ref.shape[-1]

    # linear1 (bf16 MXU operands, f32 accumulate); cast at point of use.
    x_bf = x_ref[...].astype(jnp.bfloat16)
    h = jnp.dot(x_bf, w1_ref[...], preferred_element_type=jnp.float32)

    # bias + ReLU + dropout: int8 0/1 mask -> f32, exact 0/inv_keep scaling.
    keep = mask_ref[...].astype(jnp.float32)
    h = jnp.maximum(h + b1_ref[...], 0.0) * keep * INV_KEEP

    # fused linear2 / linear3
    ms = jnp.dot(h.astype(jnp.bfloat16), w23_ref[...],
                 preferred_element_type=jnp.float32) + b23_ref[...]
    mu = ms[:, :L]
    pre_sigma = ms[:, L:]
    sigma = jnp.exp(pre_sigma)

    # reparameterized sample
    z_ref[...] = mu + sigma * eps_ref[...]

    # per-row KL: sum_L (sigma^2 + mu^2 - log(sigma) - 1/2), log(sigma)=pre_sigma
    kl_terms = sigma * sigma + mu * mu - pre_sigma - 0.5
    kl_ref[...] = jnp.sum(kl_terms, axis=-1, keepdims=True)


# ---------------------------------------------------------------------------
# One-time parameter preparation (no per-call transposes)
# ---------------------------------------------------------------------------
def prepare_params(params):
    """Transpose / pad / fuse / cast PyTorch-layout params once."""
    pad = HIDDEN_PAD - HIDDEN
    latent = params["w2"].shape[0]
    w1t = jnp.pad(params["w1"].T, ((0, 0), (0, pad))).astype(jnp.bfloat16)
    b1 = jnp.pad(params["b1"], (0, pad)).reshape(1, HIDDEN_PAD).astype(jnp.float32)
    w23t = jnp.pad(jnp.concatenate([params["w2"], params["w3"]], axis=0).T,
                   ((0, pad), (0, 0))).astype(jnp.bfloat16)
    b23 = jnp.concatenate([params["b2"], params["b3"]]
                          ).reshape(1, 2 * latent).astype(jnp.float32)
    return {"w1t": w1t, "b1": b1, "w23t": w23t, "b23": b23}


# ---------------------------------------------------------------------------
# Batch-tile selection: >= 2 tiles when possible (v7x megacore), rows a
# multiple of 8, capped at 1024 rows (amortizes per-step overhead on v6e/v5e).
# ---------------------------------------------------------------------------
def _pick_block_b(B):
    if B <= 8:
        return B                              # single tile == full batch dim
    half = -(-B // 2)                         # cdiv(B, 2) -> at least 2 tiles
    half = -(-half // 8) * 8                  # round up to a multiple of 8
    return min(1024, half)


# ---------------------------------------------------------------------------
# Forward wrapper (run this under jax.jit so the glue fuses with the kernel)
# ---------------------------------------------------------------------------
def variational_encoder_forward(x, prep, dropout_mask, eps, *, block_b=None):
    """x: (B, C, H, W). dropout_mask: (B, HIDDEN) 0/1. eps: (B, L) ~ N(0,1).

    Returns (z, kl) matching VariationalEncoder.forward in training mode.
    """
    B = x.shape[0]
    x_flat = x.reshape(B, -1).astype(jnp.float32)   # no standalone bf16 cast
    D = x_flat.shape[1]
    L = eps.shape[1]

    if block_b is None:
        block_b = _pick_block_b(B)
    block_b = max(1, min(block_b, B))
    num_tiles = pl.cdiv(B, block_b)                  # ragged grid; edge blocks
                                                     # are clipped on writeback

    # raw 0/1 mask in int8 (4x fewer bytes than f32); scale applied in-kernel.
    mask_i8 = jnp.pad(dropout_mask.astype(jnp.int8),
                      ((0, 0), (0, HIDDEN_PAD - HIDDEN)))
    eps = eps.astype(jnp.float32)

    # Advisory cost model for XLA scheduling around the custom call.
    flops = 2 * B * D * HIDDEN_PAD + 2 * B * HIDDEN_PAD * 2 * L + 8 * B * HIDDEN_PAD
    bytes_accessed = (B * D * 4 + B * HIDDEN_PAD + B * L * 4        # x, mask, eps
                      + B * L * 4 + B * 4                           # z, kl rows
                      + D * HIDDEN_PAD * 2 + HIDDEN_PAD * 4         # w1, b1
                      + HIDDEN_PAD * 2 * L * 2 + 2 * L * 4)         # w23, b23
    cost = pl.CostEstimate(flops=int(flops), transcendentals=int(B * L),
                           bytes_accessed=int(bytes_accessed))

    # Scoped-VMEM limit: actual tile footprint (double-buffered streams +
    # resident weights + intermediate headroom), floored at 32 MiB, capped
    # well below every generation's physical VMEM.
    vmem_need = (2 * block_b * D * 4                 # x tile (f32) x2
                 + 2 * D * HIDDEN_PAD * 2            # w1 bf16 (2 bufs)
                 + 2 * HIDDEN_PAD * 4                # b1
                 + 2 * HIDDEN_PAD * 2 * L * 2        # w23
                 + 2 * 2 * L * 4                     # b23
                 + 2 * block_b * HIDDEN_PAD          # int8 mask x2
                 + 4 * block_b * L * 4               # eps + z x2
                 + 2 * block_b * 128 * 4             # kl rows (lane padded)
                 + 6 * block_b * HIDDEN_PAD * 4)     # h / intermediates headroom
    vmem_limit = int(min(max(vmem_need, 32 << 20), 110 << 20))

    z, kl_rows = pl.pallas_call(
        _vae_encoder_kernel,
        grid=(num_tiles,),
        out_shape=(
            jax.ShapeDtypeStruct((B, L), jnp.float32),
            jax.ShapeDtypeStruct((B, 1), jnp.float32),
        ),
        in_specs=[
            pl.BlockSpec((block_b, D), lambda i: (i, 0)),            # x (f32)
            pl.BlockSpec((D, HIDDEN_PAD), lambda i: (0, 0)),         # w1^T (resident)
            pl.BlockSpec((1, HIDDEN_PAD), lambda i: (0, 0)),         # b1
            pl.BlockSpec((HIDDEN_PAD, 2 * L), lambda i: (0, 0)),     # [w2|w3]^T (resident)
            pl.BlockSpec((1, 2 * L), lambda i: (0, 0)),              # [b2|b3]
            pl.BlockSpec((block_b, HIDDEN_PAD), lambda i: (i, 0)),   # int8 dropout mask
            pl.BlockSpec((block_b, L), lambda i: (i, 0)),            # eps
        ],
        out_specs=(
            pl.BlockSpec((block_b, L), lambda i: (i, 0)),            # z
            pl.BlockSpec((block_b, 1), lambda i: (i, 0)),            # per-row KL
        ),
        compiler_params=pltpu.CompilerParams(
            dimension_semantics=("parallel",),                       # v7x: 2 TCs
            vmem_limit_bytes=vmem_limit),
        cost_estimate=cost,
    )(x_flat, prep["w1t"], prep["b1"], prep["w23t"], prep["b23"],
      mask_i8, eps)

    return z, jnp.sum(kl_rows)


# ---------------------------------------------------------------------------
# Reference / test harness
# ---------------------------------------------------------------------------
def init_params(key, input_dim, latent_dims):
    """Deterministic synthetic parameters matching nn.Linear (out, in) layout."""
    k1, k2, k3, k4, k5, k6 = jax.random.split(key, 6)
    s1 = 1.0 / jnp.sqrt(jnp.float32(input_dim))
    s2 = 1.0 / jnp.sqrt(jnp.float32(HIDDEN))
    return {
        "w1": jax.random.uniform(k1, (HIDDEN, input_dim), jnp.float32, -s1, s1),
        "b1": jax.random.uniform(k2, (HIDDEN,), jnp.float32, -s1, s1),
        "w2": jax.random.uniform(k3, (latent_dims, HIDDEN), jnp.float32, -s2, s2),
        "b2": jax.random.uniform(k4, (latent_dims,), jnp.float32, -s2, s2),
        "w3": jax.random.uniform(k5, (latent_dims, HIDDEN), jnp.float32, -s2, s2),
        "b3": jax.random.uniform(k6, (latent_dims,), jnp.float32, -s2, s2),
    }


def reference_forward(x, params, dropout_mask, eps):
    """Pure-JAX reference with the same bf16 rounding of matmul operands."""
    B = x.shape[0]
    x_flat = x.reshape(B, -1)
    rb = lambda a: a.astype(jnp.bfloat16).astype(jnp.float32)
    h = jnp.maximum(rb(x_flat) @ rb(params["w1"]).T + params["b1"], 0.0)
    h = h * dropout_mask.astype(jnp.float32) * INV_KEEP
    hb = rb(h)
    mu = hb @ rb(params["w2"]).T + params["b2"]
    pre = hb @ rb(params["w3"]).T + params["b3"]
    sigma = jnp.exp(pre)
    z = mu + sigma * eps
    kl = jnp.sum(sigma ** 2 + mu ** 2 - pre - 0.5)
    return z, kl


if __name__ == "__main__":
    C, H, W = 4, 16, 16
    LATENT = 8
    D = C * H * W

    root = jax.random.PRNGKey(0)
    k_p, k1, k2, k3 = jax.random.split(root, 4)
    params = init_params(k_p, D, LATENT)
    prep = prepare_params(params)          # one-time: transpose/pad/fuse/bf16

    # Wrapper glue (reshape, pads, int8 cast, final KL sum) under the same jit
    # as the kernel so nothing is dispatched as a separate un-overlapped launch.
    fwd = jax.jit(variational_encoder_forward, static_argnames=("block_b",))

    def run_case(key, B, block_b=None):
        kx, km, ke = jax.random.split(key, 3)
        x = jax.random.normal(kx, (B, C, H, W), jnp.float32)
        # Module randomness (dropout Bernoulli + N(0,1) sample) is drawn in
        # plain JAX glue and fed to the kernel so the forward is deterministic.
        mask = jax.random.bernoulli(km, p=1.0 - DROPOUT_P, shape=(B, HIDDEN))
        eps = jax.random.normal(ke, (B, LATENT), jnp.float32)

        z, kl = fwd(x, prep, mask, eps, block_b=block_b)
        jax.block_until_ready((z, kl))

        z_ref, kl_ref = reference_forward(x, params, mask, eps)
        assert jnp.allclose(z, z_ref, rtol=2e-2, atol=2e-2), f"z mismatch (B={B})"
        assert jnp.allclose(kl, kl_ref, rtol=2e-2, atol=1e-1), f"kl mismatch (B={B})"

    # small shape consistent with the module (single batch tile)
    run_case(k1, B=8)
    # multi-tile path (auto block_b=8 -> 2 tiles, parallel axis, resident weights)
    run_case(k2, B=16)
    # ragged grid path (pl.cdiv grid, last tile clipped on writeback)
    run_case(k3, B=12, block_b=8)

    print("KERNEL_OK")
</pallas_src>

<mosaic_0001>
module attributes {stable_mosaic.version = 11 : i64} {
  func.func @_vae_encoder_kernel(%arg0: i32, %arg1: memref<8x1024xf32, #tpu.memory_space<vmem>>, %arg2: memref<1024x512xbf16, #tpu.memory_space<vmem>>, %arg3: memref<1x512xf32, #tpu.memory_space<vmem>>, %arg4: memref<512x16xbf16, #tpu.memory_space<vmem>>, %arg5: memref<1x16xf32, #tpu.memory_space<vmem>>, %arg6: memref<8x512xi8, #tpu.memory_space<vmem>>, %arg7: memref<8x8xf32, #tpu.memory_space<vmem>>, %arg8: memref<8x8xf32, #tpu.memory_space<vmem>>, %arg9: memref<8x1xf32, #tpu.memory_space<vmem>>) attributes {dimension_semantics = [#tpu.dimension_semantics<parallel>], iteration_bounds = array<i64: 1>, scalar_prefetch = 0 : i64, scratch_operands = 0 : i64, tpu.core_type = #tpu.core_type<tc>, window_params = [{transform_indices = @transform_0, window_bounds = array<i64: 8, 1024>}, {pipeline_mode = #tpu.pipeline_mode<synchronous>, transform_indices = @transform_1, window_bounds = array<i64: 1024, 512>}, {pipeline_mode = #tpu.pipeline_mode<synchronous>, transform_indices = @transform_2, window_bounds = array<i64: 1, 512>}, {pipeline_mode = #tpu.pipeline_mode<synchronous>, transform_indices = @transform_3, window_bounds = array<i64: 512, 16>}, {pipeline_mode = #tpu.pipeline_mode<synchronous>, transform_indices = @transform_4, window_bounds = array<i64: 1, 16>}, {transform_indices = @transform_5, window_bounds = array<i64: 8, 512>}, {transform_indices = @transform_6, window_bounds = array<i64: 8, 8>}, {transform_indices = @transform_7, window_bounds = array<i64: 8, 8>}, {transform_indices = @transform_8, window_bounds = array<i64: 8, 1>}]} {
    %c0 = arith.constant 0 : index
    %c0_0 = arith.constant 0 : index
    %0 = vector.load %arg1[%c0, %c0_0] : memref<8x1024xf32, #tpu.memory_space<vmem>>, vector<8x1024xf32>
    %1 = arith.truncf %0 : vector<8x1024xf32> to vector<8x1024xbf16>
    %c0_1 = arith.constant 0 : index
    %c0_2 = arith.constant 0 : index
    %2 = vector.load %arg2[%c0_1, %c0_2] : memref<1024x512xbf16, #tpu.memory_space<vmem>>, vector<1024x512xbf16>
    %cst = arith.constant dense<0.000000e+00> : vector<8x512xf32>
    %3 = tpu.matmul %1, %2, %cst {dimension_numbers = #tpu.dot_dimension_numbers<[1], [0], [0], [1], [0, 0, 1, 1], [], []>} : vector<8x1024xbf16>, vector<1024x512xbf16>, vector<8x512xf32> -> vector<8x512xf32>
    %c0_3 = arith.constant 0 : index
    %c0_4 = arith.constant 0 : index
    %4 = vector.load %arg6[%c0_3, %c0_4] : memref<8x512xi8, #tpu.memory_space<vmem>>, vector<8x512xi8>
    %5 = arith.sitofp %4 : vector<8x512xi8> to vector<8x512xf32>
    %c0_5 = arith.constant 0 : index
    %c0_6 = arith.constant 0 : index
    %6 = vector.load %arg3[%c0_5, %c0_6] : memref<1x512xf32, #tpu.memory_space<vmem>>, vector<1x512xf32>
    %7 = vector.broadcast %6 : vector<1x512xf32> to vector<8x512xf32>
    %8 = arith.addf %3, %7 : vector<8x512xf32>
    %cst_7 = arith.constant 0.000000e+00 : f32
    %9 = vector.broadcast %cst_7 : f32 to vector<8x512xf32>
    %10 = arith.maximumf %8, %9 : vector<8x512xf32>
    %11 = arith.mulf %10, %5 : vector<8x512xf32>
    %cst_8 = arith.constant 1.17647064 : f32
    %12 = vector.broadcast %cst_8 : f32 to vector<8x512xf32>
    %13 = arith.mulf %11, %12 : vector<8x512xf32>
    %14 = arith.truncf %13 : vector<8x512xf32> to vector<8x512xbf16>
    %c0_9 = arith.constant 0 : index
    %c0_10 = arith.constant 0 : index
    %15 = vector.load %arg4[%c0_9, %c0_10] : memref<512x16xbf16, #tpu.memory_space<vmem>>, vector<512x16xbf16>
    %cst_11 = arith.constant dense<0.000000e+00> : vector<8x16xf32>
    %16 = tpu.matmul %14, %15, %cst_11 {dimension_numbers = #tpu.dot_dimension_numbers<[1], [0], [0], [1], [0, 0, 1, 1], [], []>} : vector<8x512xbf16>, vector<512x16xbf16>, vector<8x16xf32> -> vector<8x16xf32>
    %c0_12 = arith.constant 0 : index
    %c0_13 = arith.constant 0 : index
    %17 = vector.load %arg5[%c0_12, %c0_13] : memref<1x16xf32, #tpu.memory_space<vmem>>, vector<1x16xf32>
    %18 = vector.broadcast %17 : vector<1x16xf32> to vector<8x16xf32>
    %19 = arith.addf %16, %18 : vector<8x16xf32>
    %20 = vector.extract_strided_slice %19 {offsets = [0, 0], sizes = [8, 8], strides = [1, 1]} : vector<8x16xf32> to vector<8x8xf32>
    %21 = vector.extract_strided_slice %19 {offsets = [0, 8], sizes = [8, 8], strides = [1, 1]} : vector<8x16xf32> to vector<8x8xf32>
    %22 = math.exp %21 : vector<8x8xf32>
    %c0_14 = arith.constant 0 : index
    %c0_15 = arith.constant 0 : index
    %23 = vector.load %arg7[%c0_14, %c0_15] : memref<8x8xf32, #tpu.memory_space<vmem>>, vector<8x8xf32>
    %24 = arith.mulf %22, %23 : vector<8x8xf32>
    %25 = arith.addf %20, %24 : vector<8x8xf32>
    %c0_16 = arith.constant 0 : index
    %c0_17 = arith.constant 0 : index
    %26 = vector.load %arg8[%c0_16, %c0_17] : memref<8x8xf32, #tpu.memory_space<vmem>>, vector<8x8xf32>
    tpu.vector_store %arg8[%c0_16, %c0_17], %25 {strides = array<i32>} : memref<8x8xf32, #tpu.memory_space<vmem>>, vector<8x8xf32>,
    %27 = arith.mulf %22, %22 : vector<8x8xf32>
    %28 = arith.mulf %20, %20 : vector<8x8xf32>
    %29 = arith.addf %27, %28 : vector<8x8xf32>
    %30 = arith.subf %29, %21 : vector<8x8xf32>
    %cst_18 = arith.constant 5.000000e-01 : f32
    %31 = vector.broadcast %cst_18 : f32 to vector<8x8xf32>
    %32 = arith.subf %30, %31 : vector<8x8xf32>
    %cst_19 = arith.constant dense<0.000000e+00> : vector<8xf32>
    %33 = vector.multi_reduction <add>, %32, %cst_19 [1] : vector<8x8xf32> to vector<8xf32>
    %34 = vector.shape_cast %33 : vector<8xf32> to vector<8x1xf32>
    %c0_20 = arith.constant 0 : index
    %c0_21 = arith.constant 0 : index
    %35 = vector.load %arg9[%c0_20, %c0_21] : memref<8x1xf32, #tpu.memory_space<vmem>>, vector<8x1xf32>
    tpu.vector_store %arg9[%c0_20, %c0_21], %34 {strides = array<i32>} : memref<8x1xf32, #tpu.memory_space<vmem>>, vector<8x1xf32>,
    return
  }
  func.func @transform_0(%arg0: i32) -> (i32, i32) {
    %c0_i32 = arith.constant 0 : i32
    %c0_i32_0 = arith.constant 0 : i32
    return %arg0, %c0_i32 : i32, i32
  }
  func.func @transform_1(%arg0: i32) -> (i32, i32) {
    %c0_i32 = arith.constant 0 : i32
    %c0_i32_0 = arith.constant 0 : i32
    %c0_i32_1 = arith.constant 0 : i32
    return %c0_i32, %c0_i32_0 : i32, i32
  }
  func.func @transform_2(%arg0: i32) -> (i32, i32) {
    %c0_i32 = arith.constant 0 : i32
    %c0_i32_0 = arith.constant 0 : i32
    %c0_i32_1 = arith.constant 0 : i32
    return %c0_i32, %c0_i32_0 : i32, i32
  }
  func.func @transform_3(%arg0: i32) -> (i32, i32) {
    %c0_i32 = arith.constant 0 : i32
    %c0_i32_0 = arith.constant 0 : i32
    %c0_i32_1 = arith.constant 0 : i32
    return %c0_i32, %c0_i32_0 : i32, i32
  }
  func.func @transform_4(%arg0: i32) -> (i32, i32) {
    %c0_i32 = arith.constant 0 : i32
    %c0_i32_0 = arith.constant 0 : i32
    %c0_i32_1 = arith.constant 0 : i32
    return %c0_i32, %c0_i32_0 : i32, i32
  }
  func.func @transform_5(%arg0: i32) -> (i32, i32) {
    %c0_i32 = arith.constant 0 : i32
    %c0_i32_0 = arith.constant 0 : i32
    return %arg0, %c0_i32 : i32, i32
  }
  func.func @transform_6(%arg0: i32) -> (i32, i32) {
    %c0_i32 = arith.constant 0 : i32
    %c0_i32_0 = arith.constant 0 : i32
    return %arg0, %c0_i32 : i32, i32
  }
  func.func @transform_7(%arg0: i32) -> (i32, i32) {
    %c0_i32 = arith.constant 0 : i32
    %c0_i32_0 = arith.constant 0 : i32
    return %arg0, %c0_i32 : i32, i32
  }
  func.func @transform_8(%arg0: i32) -> (i32, i32) {
    %c0_i32 = arith.constant 0 : i32
    %c0_i32_0 = arith.constant 0 : i32
    return %arg0, %c0_i32 : i32, i32
  }
}

</mosaic_0001>

<bundles_post_ra>
// kernel: variational_encoder_forward.1
= control target key start
LH: loop header
LB: loop body
LE: loop exit
PB: predicated region body
PF: predicated region fallthrough
CT: control target
= control target key end

     0   :  { %14 = vsyncpa [#allocation3], 0  ;;  %s3412_s0 = inlined_call_operand.vmem [shape: f32[8,1024], index: 0, kind: input, shape index: {}]   ;;  %s3413_s1 = inlined_call_operand.hbm [shape: bf16[1024,512], index: 1, kind: input, shape index: {}]   ;;  %s3414_s2 = inlined_call_operand.vmem [shape: f32[1,512], index: 2, kind: input, shape index: {}]   ;;  %s3415_s3 = inlined_call_operand.vmem [shape: bf16[512,16], index: 3, kind: input, shape index: {}]   ;;  %s3416_s4 = inlined_call_operand.vmem [shape: f32[1,16], index: 4, kind: input, shape index: {}]   ;;  %s3417_s5 = inlined_call_operand.vmem [shape: s8[8,512], index: 5, kind: input, shape index: {}]   ;;  %s3418_s6 = inlined_call_operand.vmem [shape: f32[8,8], index: 6, kind: input, shape index: {}]   ;;  %s3419_s7 = inlined_call_operand.hbm [shape: f32[8,8], index: 7, kind: output, shape index: {0}]   ;;  %s3420_s8 = inlined_call_operand.vmem [shape: f32[8,1], index: 8, kind: output, shape index: {1}]  }
   0x1   :  { %15 = vsyncpa [#allocation4], 0  ;;  %s3200_s27 = smov [#allocation2]   ;;  %s3152_s9 = scalar_lea.hbm %s3413_s1, 32768 }
   0x2   :  { %s23_s28 = sshll.u32 %s3200_s27, 4  ;;  %p3153_p0 = scmp.ne.s32.totalorder %s3413_s1, %s3152_s9  ;;  %s24_s28 = int_to_ptr.vmem [resolvable:$true] %s23_s28 }
   0x3   :  { %p3156_p1 = scmp.lt.u32.totalorder %s3152_s9, %s3413_s1 }
   0x5   :  { %p3158_p2 = pnand %p3156_p1, %p3153_p0 }
   0x7   :  { %3161 = shalt.err (!%p3158_p2)
}
   0x8   :  { %s3162_s14 = scalar_lea.vmem %s24_s28, 32768  ;;  %p3167_p4 = scmp.lt.s32.totalorder %s24_s28, %s24_s28 }
   0x9   :  { %p3163_p3 = scmp.ne.s32.totalorder %s24_s28, %s3162_s14  ;;  %p3168_p5 = scmp.lt.s32.totalorder %s3162_s14, %s3162_s14 }
   0xb   :  { %p3169_p6 = por %p3168_p5, %p3167_p4 }
   0xd   :  { %p3170_p7 = pnand %p3169_p6, %p3163_p3 }
   0xf   :  { %3173 = shalt.err (!%p3170_p7)
}
  0x10   :  { %s3201_s15 = smov 256   ;;  %s3202_s16 = smov 16  }
  0x11   :  { %29 = dma.hbm_to_vmem [thread:$0]  %s3413_s1, 32768, %s24_s28, [#allocation3], %s3201_s15, %s3201_s15, %s3202_s16  }
  0x12   :  { %3196 = dma.done.wait [#allocation3], 32768  }
  0x13   :  { %3197 = vsyncadd [#allocation3], 4294934528  ;;  %v2734_v0 = vld [vmem:[#allocation2 + $0x4] ss:$16 sps:$4 sm:$0xff]   ;;  %v2736_v1 = vld [vmem:[#allocation2 + $0xc] ss:$16 sps:$4 sm:$0xff]  }
  0x14   :  { %1627 = vmatprep.subr.bf16.mxu0 %v2734_v0  ;;  %v2738_v2 = vld [vmem:[#allocation2] ss:$16 sps:$4 sm:$0xff]   ;;  %v2739_v3 = vld [vmem:[#allocation2 + $0x8] ss:$16 sps:$4 sm:$0xff]   ;;  %1791 = vmatprep.subr.bf16.mxu1 %v2736_v1  ;;  %v2740_v4 = vld [vmem:[#allocation2 + $0x24] ss:$16 sps:$4 sm:$0xff]  }
  0x15   :  { %1628 = vmatpush1.bf16.msra.mxu0 %v2738_v2  ;;  %1792 = vmatpush1.bf16.msra.mxu1 %v2739_v3  ;;  %v2742_v5 = vld [vmem:[#allocation2 + $0x2c] ss:$16 sps:$4 sm:$0xff]   ;;  %v2744_v6 = vld [vmem:[#allocation2 + $0x20] ss:$16 sps:$4 sm:$0xff]   ;;  %v2745_v7 = vld [vmem:[#allocation2 + $0x28] ss:$16 sps:$4 sm:$0xff]  }
  0x16   :  { %1629 = vmatprep.subr.bf16.mxu0 %v2740_v4  ;;  %1793 = vmatprep.subr.bf16.mxu1 %v2742_v5  ;;  %v2746_v8 = vld [vmem:[#allocation2 + $0x44] ss:$16 sps:$4 sm:$0xff]   ;;  %v2748_v9 = vld [vmem:[#allocation2 + $0x4c] ss:$16 sps:$4 sm:$0xff]   ;;  %v2750_v10 = vld [vmem:[#allocation2 + $0x40] ss:$16 sps:$4 sm:$0xff]  }
  0x17   :  { %v2751_v11 = vld [vmem:[#allocation2 + $0x48] ss:$16 sps:$4 sm:$0xff]   ;;  %v2752_v12 = vld [vmem:[#allocation2 + $0x64] ss:$16 sps:$4 sm:$0xff]   ;;  %v2754_v13 = vld [vmem:[#allocation2 + $0x6c] ss:$16 sps:$4 sm:$0xff]  }
  0x18   :  { %v2756_v14 = vld [vmem:[#allocation2 + $0x60] ss:$16 sps:$4 sm:$0xff]   ;;  %v2757_v15 = vld [vmem:[#allocation2 + $0x68] ss:$16 sps:$4 sm:$0xff]   ;;  %v2758_v16 = vld [vmem:[#allocation2 + $0x84] ss:$16 sps:$4 sm:$0xff]  }
  0x19   :  { %1630 = vmatpush1.bf16.msra.mxu0 %v2744_v6  ;;  %1794 = vmatpush1.bf16.msra.mxu1 %v2745_v7  ;;  %v2760_v17 = vld [vmem:[#allocation2 + $0x8c] ss:$16 sps:$4 sm:$0xff]   ;;  %v2762_v18 = vld [vmem:[#allocation2 + $0x80] ss:$16 sps:$4 sm:$0xff]   ;;  %v2763_v19 = vld [vmem:[#allocation2 + $0x88] ss:$16 sps:$4 sm:$0xff]  }
  0x1a   :  { %1631 = vmatprep.subr.bf16.mxu0 %v2746_v8  ;;  %1795 = vmatprep.subr.bf16.mxu1 %v2748_v9  ;;  %v2764_v20 = vld [vmem:[#allocation2 + $0xa4] ss:$16 sps:$4 sm:$0xff]   ;;  %v2766_v21 = vld [vmem:[#allocation2 + $0xac] ss:$16 sps:$4 sm:$0xff]   ;;  %v2768_v22 = vld [vmem:[#allocation2 + $0xa0] ss:$16 sps:$4 sm:$0xff]  }
  0x1b   :  { %v2769_v23 = vld [vmem:[#allocation2 + $0xa8] ss:$16 sps:$4 sm:$0xff]   ;;  %v2770_v24 = vld [vmem:[#allocation2 + $0xc4] ss:$16 sps:$4 sm:$0xff]   ;;  %v2772_v25 = vld [vmem:[#allocation2 + $0xcc] ss:$16 sps:$4 sm:$0xff]  }
  0x1c   :  { %v2774_v26 = vld [vmem:[#allocation2 + $0xc0] ss:$16 sps:$4 sm:$0xff]   ;;  %v2775_v27 = vld [vmem:[#allocation2 + $0xc8] ss:$16 sps:$4 sm:$0xff]   ;;  %v2776_v28 = vld [vmem:[#allocation2 + $0xe4] ss:$16 sps:$4 sm:$0xff]  }
  0x1d   :  { %1632 = vmatpush1.bf16.msra.mxu0 %v2750_v10  ;;  %1796 = vmatpush1.bf16.msra.mxu1 %v2751_v11  ;;  %v2778_v29 = vld [vmem:[#allocation2 + $0xec] ss:$16 sps:$4 sm:$0xff]   ;;  %v2780_v30 = vld [vmem:[#allocation2 + $0xe0] ss:$16 sps:$4 sm:$0xff]   ;;  %v2781_v31 = vld [vmem:[#allocation2 + $0xe8] ss:$16 sps:$4 sm:$0xff]  }
  0x1e   :  { %1633 = vmatprep.subr.bf16.mxu0 %v2752_v12  ;;  %1797 = vmatprep.subr.bf16.mxu1 %v2754_v13  ;;  %v2782_v32 = vld [vmem:[#allocation2 + $0x104] ss:$16 sps:$4 sm:$0xff]   ;;  %v2784_v33 = vld [vmem:[#allocation2 + $0x10c] ss:$16 sps:$4 sm:$0xff]   ;;  %v2786_v34 = vld [vmem:[#allocation2 + $0x100] ss:$16 sps:$4 sm:$0xff]  }
  0x1f   :  { %v2787_v35 = vld [vmem:[#allocation2 + $0x108] ss:$16 sps:$4 sm:$0xff]   ;;  %v2788_v36 = vld [vmem:[#allocation2 + $0x124] ss:$16 sps:$4 sm:$0xff]   ;;  %v2790_v37 = vld [vmem:[#allocation2 + $0x12c] ss:$16 sps:$4 sm:$0xff]  }
  0x20   :  { %v2792_v38 = vld [vmem:[#allocation2 + $0x120] ss:$16 sps:$4 sm:$0xff]   ;;  %v2793_v39 = vld [vmem:[#allocation2 + $0x128] ss:$16 sps:$4 sm:$0xff]   ;;  %v2794_v40 = vld [vmem:[#allocation2 + $0x144] ss:$16 sps:$4 sm:$0xff]  }
  0x21   :  { %1634 = vmatpush1.bf16.msra.mxu0 %v2756_v14  ;;  %1798 = vmatpush1.bf16.msra.mxu1 %v2757_v15  ;;  %v2796_v41 = vld [vmem:[#allocation2 + $0x14c] ss:$16 sps:$4 sm:$0xff]   ;;  %v2798_v42 = vld [vmem:[#allocation2 + $0x140] ss:$16 sps:$4 sm:$0xff]   ;;  %v2799_v43 = vld [vmem:[#allocation2 + $0x148] ss:$16 sps:$4 sm:$0xff]  }
  0x22   :  { %1635 = vmatprep.subr.bf16.mxu0 %v2758_v16  ;;  %1799 = vmatprep.subr.bf16.mxu1 %v2760_v17  ;;  %v2800_v44 = vld [vmem:[#allocation2 + $0x164] ss:$16 sps:$4 sm:$0xff]   ;;  %v2802_v45 = vld [vmem:[#allocation2 + $0x16c] ss:$16 sps:$4 sm:$0xff]   ;;  %v2804_v47 = vld [vmem:[#allocation2 + $0x160] ss:$16 sps:$4 sm:$0xff]  }
  0x23   :  { %v45_v46 = vld [vmem:[%s3412_s0 + $0x8] sm:$0xff]  ;;  %v2806_v50 = vld [vmem:[#allocation2 + $0x184] ss:$16 sps:$4 sm:$0xff]   ;;  %v2810_v52 = vld [vmem:[#allocation2 + $0x180] ss:$16 sps:$4 sm:$0xff]   ;;  %s3203_s28 = smov 8  }
  0x24   :  { %v53_v48 = vpack.c.bf16 %v45_v46, %v45_v46  ;;  %v2805_v49 = vld [vmem:[#allocation2 + $0x168] ss:$16 sps:$4 sm:$0xff]   ;;  %v2808_v51 = vld [vmem:[#allocation2 + $0x18c] ss:$16 sps:$4 sm:$0xff]   ;;  %v2812_v54 = vld [vmem:[#allocation2 + $0x1a4] ss:$16 sps:$4 sm:$0xff]  }
  0x25   :  { %1636 = vmatpush1.bf16.msra.mxu0 %v2762_v18  ;;  %1800 = vmatpush1.bf16.msra.mxu1 %v2763_v19  ;;  %v2811_v53 = vld [vmem:[#allocation2 + $0x188] ss:$16 sps:$4 sm:$0xff]   ;;  %v2814_v55 = vld [vmem:[#allocation2 + $0x1ac] ss:$16 sps:$4 sm:$0xff]   ;;  %v2816_v56 = vld [vmem:[#allocation2 + $0x1a0] ss:$16 sps:$4 sm:$0xff]  }
  0x26   :  { %1637 = vmatprep.subr.bf16.mxu0 %v2764_v20  ;;  %1801 = vmatprep.subr.bf16.mxu1 %v2766_v21  ;;  %v2817_v57 = vld [vmem:[#allocation2 + $0x1a8] ss:$16 sps:$4 sm:$0xff]   ;;  %v2818_v58 = vld [vmem:[#allocation2 + $0x1c4] ss:$16 sps:$4 sm:$0xff]   ;;  %v2820_v59 = vld [vmem:[#allocation2 + $0x1cc] ss:$16 sps:$4 sm:$0xff]  }
  0x27   :  { %1659 = vmatprep.mubr.bf16.mxu0 %v53_v48  ;;  %1823 = vmatprep.mubr.bf16.mxu1 %v53_v48  ;;  %v2822_v60 = vld [vmem:[#allocation2 + $0x1c0] ss:$16 sps:$4 sm:$0xff]   ;;  %v2823_v61 = vld [vmem:[#allocation2 + $0x1c8] ss:$16 sps:$4 sm:$0xff]   ;;  %v2824_v62 = vld [vmem:[#allocation2 + $0x1e4] ss:$16 sps:$4 sm:$0xff]  }
  0x28   :  { %v2826_v63 = vld [vmem:[#allocation2 + $0x1ec] ss:$16 sps:$4 sm:$0xff]   ;;  %v2828_v0 = vld [vmem:[#allocation2 + $0x1e0] ss:$16 sps:$4 sm:$0xff]   ;;  %v2829_v1 = vld [vmem:[#allocation2 + $0x1e8] ss:$16 sps:$4 sm:$0xff]  }
  0x29   :  { %1638 = vmatpush1.bf16.msra.mxu0 %v2768_v22  ;;  %1802 = vmatpush1.bf16.msra.mxu1 %v2769_v23  ;;  %v44_v2 = vld [vmem:[%s3412_s0] sm:$0xff]  ;;  %v2835_v4 = vld [vmem:[#allocation2 + $0x20c] ss:$16 sps:$4 sm:$0xff]   ;;  %v2833_v7 = vld [vmem:[#allocation2 + $0x208] ss:$16 sps:$4 sm:$0xff]   ;;  %vm2327_vm0 = vcmask 64512  }
  0x2a   :  { %1639 = vmatprep.subr.bf16.mxu0 %v2770_v24  ;;  %1803 = vmatprep.subr.bf16.mxu1 %v2772_v25  ;;  %v2832_v3 = vld [vmem:[#allocation2 + $0x204] ss:$16 sps:$4 sm:$0xff]   ;;  %v52_v5 = vpack.c.bf16 %v44_v2, %v44_v2  ;;  %v2830_v6 = vld [vmem:[#allocation2 + $0x200] ss:$16 sps:$4 sm:$0xff]   ;;  %v2841_v9 = vld [vmem:[#allocation2 + $0x22c] ss:$16 sps:$4 sm:$0xff]  }
  0x2b   :  { %v2838_v8 = vld [vmem:[#allocation2 + $0x224] ss:$16 sps:$4 sm:$0xff]   ;;  %v2836_v10 = vld [vmem:[#allocation2 + $0x220] ss:$16 sps:$4 sm:$0xff]   ;;  %v2839_v11 = vld [vmem:[#allocation2 + $0x228] ss:$16 sps:$4 sm:$0xff]  }
  0x2c   :  { %v2844_v12 = vld [vmem:[#allocation2 + $0x244] ss:$16 sps:$4 sm:$0xff]   ;;  %v2847_v13 = vld [vmem:[#allocation2 + $0x24c] ss:$16 sps:$4 sm:$0xff]   ;;  %v2842_v14 = vld [vmem:[#allocation2 + $0x240] ss:$16 sps:$4 sm:$0xff]  }
  0x2d   :  { %1640 = vmatpush1.bf16.msra.mxu0 %v2774_v26  ;;  %1804 = vmatpush1.bf16.msra.mxu1 %v2775_v27  ;;  %v2845_v15 = vld [vmem:[#allocation2 + $0x248] ss:$16 sps:$4 sm:$0xff]   ;;  %v2850_v16 = vld [vmem:[#allocation2 + $0x264] ss:$16 sps:$4 sm:$0xff]   ;;  %v2853_v17 = vld [vmem:[#allocation2 + $0x26c] ss:$16 sps:$4 sm:$0xff]  }
  0x2e   :  { %1641 = vmatprep.subr.bf16.mxu0 %v2776_v28  ;;  %1805 = vmatprep.subr.bf16.mxu1 %v2778_v29  ;;  %v2848_v18 = vld [vmem:[#allocation2 + $0x260] ss:$16 sps:$4 sm:$0xff]   ;;  %v2851_v19 = vld [vmem:[#allocation2 + $0x268] ss:$16 sps:$4 sm:$0xff]   ;;  %v2856_v20 = vld [vmem:[#allocation2 + $0x284] ss:$16 sps:$4 sm:$0xff]  }
  0x2f   :  { %v2859_v21 = vld [vmem:[#allocation2 + $0x28c] ss:$16 sps:$4 sm:$0xff]   ;;  %v2854_v22 = vld [vmem:[#allocation2 + $0x280] ss:$16 sps:$4 sm:$0xff]   ;;  %v2857_v23 = vld [vmem:[#allocation2 + $0x288] ss:$16 sps:$4 sm:$0xff]  }
  0x30   :  { %v2862_v24 = vld [vmem:[#allocation2 + $0x2a4] ss:$16 sps:$4 sm:$0xff]   ;;  %v2865_v25 = vld [vmem:[#allocation2 + $0x2ac] ss:$16 sps:$4 sm:$0xff]   ;;  %v2860_v26 = vld [vmem:[#allocation2 + $0x2a0] ss:$16 sps:$4 sm:$0xff]  }
  0x31   :  { %1642 = vmatpush1.bf16.msra.mxu0 %v2780_v30  ;;  %1806 = vmatpush1.bf16.msra.mxu1 %v2781_v31  ;;  %v2863_v27 = vld [vmem:[#allocation2 + $0x2a8] ss:$16 sps:$4 sm:$0xff]   ;;  %v2868_v28 = vld [vmem:[#allocation2 + $0x2c4] ss:$16 sps:$4 sm:$0xff]   ;;  %v2871_v29 = vld [vmem:[#allocation2 + $0x2cc] ss:$16 sps:$4 sm:$0xff]  }
  0x32   :  { %1643 = vmatprep.subr.bf16.mxu0 %v2782_v32  ;;  %1807 = vmatprep.subr.bf16.mxu1 %v2784_v33  ;;  %v47_v30 = vld [vmem:[%s3412_s0 + $0x18] sm:$0xff]  ;;  %v2866_v31 = vld [vmem:[#allocation2 + $0x2c0] ss:$16 sps:$4 sm:$0xff]   ;;  %v2892_v46 = vld [vmem:[#allocation2 + $0x344] ss:$16 sps:$4 sm:$0xff]  }
  0x33   :  { %v55_v32 = vpack.c.bf16 %v47_v30, %v47_v30  ;;  %v2869_v33 = vld [vmem:[#allocation2 + $0x2c8] ss:$16 sps:$4 sm:$0xff]   ;;  %v2890_v48 = vld [vmem:[#allocation2 + $0x340] ss:$16 sps:$4 sm:$0xff]   ;;  %v2922_v2 = vld [vmem:[#allocation2 + $0x3e4] ss:$16 sps:$4 sm:$0xff]  }
  0x34   :  { %v2958_v30 = vld [vmem:[#allocation2 + $0x4a4] ss:$16 sps:$4 sm:$0xff]  }
  0x35   :  { %1644 = vmatpush1.bf16.msra.mxu0 %v2786_v34  ;;  %1808 = vmatpush1.bf16.msra.mxu1 %v2787_v35  ;;  %v2874_v34 = vld [vmem:[#allocation2 + $0x2e4] ss:$16 sps:$4 sm:$0xff]   ;;  %v2877_v35 = vld [vmem:[#allocation2 + $0x2ec] ss:$16 sps:$4 sm:$0xff]  }
  0x36   :  { %1645 = vmatprep.subr.bf16.mxu0 %v2788_v36  ;;  %1809 = vmatprep.subr.bf16.mxu1 %v2790_v37  ;;  %v2872_v36 = vld [vmem:[#allocation2 + $0x2e0] ss:$16 sps:$4 sm:$0xff]   ;;  %v2875_v37 = vld [vmem:[#allocation2 + $0x2e8] ss:$16 sps:$4 sm:$0xff]  }
  0x39   :  { %1646 = vmatpush1.bf16.msra.mxu0 %v2792_v38  ;;  %1810 = vmatpush1.bf16.msra.mxu1 %v2793_v39  ;;  %v2880_v38 = vld [vmem:[#allocation2 + $0x304] ss:$16 sps:$4 sm:$0xff]   ;;  %v2883_v39 = vld [vmem:[#allocation2 + $0x30c] ss:$16 sps:$4 sm:$0xff]  }
  0x3a   :  { %1647 = vmatprep.subr.bf16.mxu0 %v2794_v40  ;;  %1811 = vmatprep.subr.bf16.mxu1 %v2796_v41  ;;  %v2878_v40 = vld [vmem:[#allocation2 + $0x300] ss:$16 sps:$4 sm:$0xff]   ;;  %v2881_v41 = vld [vmem:[#allocation2 + $0x308] ss:$16 sps:$4 sm:$0xff]  }
  0x3d   :  { %1648 = vmatpush1.bf16.msra.mxu0 %v2798_v42  ;;  %1812 = vmatpush1.bf16.msra.mxu1 %v2799_v43  ;;  %v2886_v42 = vld [vmem:[#allocation2 + $0x324] ss:$16 sps:$4 sm:$0xff]   ;;  %v2889_v43 = vld [vmem:[#allocation2 + $0x32c] ss:$16 sps:$4 sm:$0xff]  }
  0x3e   :  { %1649 = vmatprep.subr.bf16.mxu0 %v2800_v44  ;;  %1813 = vmatprep.subr.bf16.mxu1 %v2802_v45  ;;  %v2884_v44 = vld [vmem:[#allocation2 + $0x320] ss:$16 sps:$4 sm:$0xff]   ;;  %v2887_v45 = vld [vmem:[#allocation2 + $0x328] ss:$16 sps:$4 sm:$0xff]  }
  0x41   :  { %1650 = vmatpush1.bf16.msra.mxu0 %v2804_v47  ;;  %1814 = vmatpush1.bf16.msra.mxu1 %v2805_v49  ;;  %v2895_v47 = vld [vmem:[#allocation2 + $0x34c] ss:$16 sps:$4 sm:$0xff]   ;;  %v2893_v49 = vld [vmem:[#allocation2 + $0x348] ss:$16 sps:$4 sm:$0xff]  }
  0x42   :  { %1651 = vmatprep.subr.bf16.mxu0 %v2806_v50  ;;  %1815 = vmatprep.subr.bf16.mxu1 %v2808_v51  ;;  %v2898_v50 = vld [vmem:[#allocation2 + $0x364] ss:$16 sps:$4 sm:$0xff]   ;;  %v2901_v51 = vld [vmem:[#allocation2 + $0x36c] ss:$16 sps:$4 sm:$0xff]  }
  0x45   :  { %1652 = vmatpush1.bf16.msra.mxu0 %v2810_v52  ;;  %1816 = vmatpush1.bf16.msra.mxu1 %v2811_v53  ;;  %v2896_v52 = vld [vmem:[#allocation2 + $0x360] ss:$16 sps:$4 sm:$0xff]   ;;  %v2899_v53 = vld [vmem:[#allocation2 + $0x368] ss:$16 sps:$4 sm:$0xff]  }
  0x46   :  { %1653 = vmatprep.subr.bf16.mxu0 %v2812_v54  ;;  %1817 = vmatprep.subr.bf16.mxu1 %v2814_v55  ;;  %v2904_v54 = vld [vmem:[#allocation2 + $0x384] ss:$16 sps:$4 sm:$0xff]   ;;  %v2907_v55 = vld [vmem:[#allocation2 + $0x38c] ss:$16 sps:$4 sm:$0xff]  }
  0x49   :  { %1654 = vmatpush1.bf16.msra.mxu0 %v2816_v56  ;;  %1818 = vmatpush1.bf16.msra.mxu1 %v2817_v57  ;;  %v2902_v56 = vld [vmem:[#allocation2 + $0x380] ss:$16 sps:$4 sm:$0xff]   ;;  %v2905_v57 = vld [vmem:[#allocation2 + $0x388] ss:$16 sps:$4 sm:$0xff]  }
  0x4a   :  { %1655 = vmatprep.subr.bf16.mxu0 %v2818_v58  ;;  %1819 = vmatprep.subr.bf16.mxu1 %v2820_v59  ;;  %v2910_v58 = vld [vmem:[#allocation2 + $0x3a4] ss:$16 sps:$4 sm:$0xff]   ;;  %v2913_v59 = vld [vmem:[#allocation2 + $0x3ac] ss:$16 sps:$4 sm:$0xff]  }
  0x4d   :  { %1656 = vmatpush1.bf16.msra.mxu0 %v2822_v60  ;;  %1820 = vmatpush1.bf16.msra.mxu1 %v2823_v61  ;;  %v2908_v60 = vld [vmem:[#allocation2 + $0x3a0] ss:$16 sps:$4 sm:$0xff]   ;;  %v2911_v61 = vld [vmem:[#allocation2 + $0x3a8] ss:$16 sps:$4 sm:$0xff]  }
  0x4e   :  { %1657 = vmatprep.subr.bf16.mxu0 %v2824_v62  ;;  %1821 = vmatprep.subr.bf16.mxu1 %v2826_v63  ;;  %v2916_v62 = vld [vmem:[#allocation2 + $0x3c4] ss:$16 sps:$4 sm:$0xff]   ;;  %v2919_v63 = vld [vmem:[#allocation2 + $0x3cc] ss:$16 sps:$4 sm:$0xff]  }
  0x51   :  { %1658 = vmatpush1.bf16.msra.mxu0 %v2828_v0  ;;  %1822 = vmatpush1.bf16.msra.mxu1 %v2829_v1  ;;  %v2914_v0 = vld [vmem:[#allocation2 + $0x3c0] ss:$16 sps:$4 sm:$0xff]   ;;  %v2917_v1 = vld [vmem:[#allocation2 + $0x3c8] ss:$16 sps:$4 sm:$0xff]  }
  0x52   :  { %1668 = vmatprep.subr.bf16.mxu0 %v2832_v3  ;;  %1832 = vmatprep.subr.bf16.mxu1 %v2835_v4  ;;  %v2925_v3 = vld [vmem:[#allocation2 + $0x3ec] ss:$16 sps:$4 sm:$0xff]   ;;  %v2920_v4 = vld [vmem:[#allocation2 + $0x3e0] ss:$16 sps:$4 sm:$0xff]  }
  0x54   :  { %1660 = vmatmul.mubr.bf16.vlgmr.msra.gmra.mrb[0].mxu0 %v52_v5  ;;  %1824 = vmatmul.mubr.bf16.vlgmr.msra.gmra.mrb[0].mxu1 %v52_v5  ;;  %v2923_v5 = vld [vmem:[#allocation2 + $0x3e8] ss:$16 sps:$4 sm:$0xff]  }
  0x55   :  { %1669 = vmatpush1.bf16.msra.mxu0 %v2830_v6  ;;  %1833 = vmatpush1.bf16.msra.mxu1 %v2833_v7  ;;  %v2928_v6 = vld [vmem:[#allocation2 + $0x404] ss:$16 sps:$4 sm:$0xff]  }
  0x56   :  { %1670 = vmatprep.subr.bf16.mxu0 %v2838_v8  ;;  %1834 = vmatprep.subr.bf16.mxu1 %v2841_v9  ;;  %v46_v7 = vld [vmem:[%s3412_s0 + $0x10] sm:$0xff]  ;;  %v2931_v8 = vld [vmem:[#allocation2 + $0x40c] ss:$16 sps:$4 sm:$0xff]  }
  0x57   :  { %1700 = vmatprep.mubr.bf16.mxu0 %v55_v32  ;;  %1864 = vmatprep.mubr.bf16.mxu1 %v55_v32  ;;  %v2926_v9 = vld [vmem:[#allocation2 + $0x400] ss:$16 sps:$4 sm:$0xff]  }
  0x58   :  { %v2956_v32 = vld [vmem:[#allocation2 + $0x4a0] ss:$16 sps:$4 sm:$0xff]  }
  0x59   :  { %1671 = vmatpush1.bf16.msra.mxu0 %v2836_v10  ;;  %1835 = vmatpush1.bf16.msra.mxu1 %v2839_v11  ;;  %v2929_v10 = vld [vmem:[#allocation2 + $0x408] ss:$16 sps:$4 sm:$0xff]   ;;  %v54_v11 = vpack.c.bf16 %v46_v7, %v46_v7  ;;  %v3021_v7 = vld [vmem:[#allocation2 + $0x5ec] ss:$16 sps:$4 sm:$0xff]  }
  0x5a   :  { %1672 = vmatprep.subr.bf16.mxu0 %v2844_v12  ;;  %1836 = vmatprep.subr.bf16.mxu1 %v2847_v13  ;;  %v2934_v12 = vld [vmem:[#allocation2 + $0x424] ss:$16 sps:$4 sm:$0xff]   ;;  %v2937_v13 = vld [vmem:[#allocation2 + $0x42c] ss:$16 sps:$4 sm:$0xff]  }
  0x5d   :  { %1673 = vmatpush1.bf16.msra.mxu0 %v2842_v14  ;;  %1837 = vmatpush1.bf16.msra.mxu1 %v2845_v15  ;;  %v49_v14 = vld [vmem:[%s3412_s0 + $0x28] sm:$0xff] }
  0x5e   :  { %1674 = vmatprep.subr.bf16.mxu0 %v2850_v16  ;;  %1838 = vmatprep.subr.bf16.mxu1 %v2853_v17  ;;  %v57_v15 = vpack.c.bf16 %v49_v14, %v49_v14  ;;  %v2932_v16 = vld [vmem:[#allocation2 + $0x420] ss:$16 sps:$4 sm:$0xff]   ;;  %v2935_v17 = vld [vmem:[#allocation2 + $0x428] ss:$16 sps:$4 sm:$0xff]  }
  0x61   :  { %1675 = vmatpush1.bf16.msra.mxu0 %v2848_v18  ;;  %1839 = vmatpush1.bf16.msra.mxu1 %v2851_v19  ;;  %v2940_v18 = vld [vmem:[#allocation2 + $0x444] ss:$16 sps:$4 sm:$0xff]   ;;  %v2943_v19 = vld [vmem:[#allocation2 + $0x44c] ss:$16 sps:$4 sm:$0xff]  }
  0x62   :  { %1676 = vmatprep.subr.bf16.mxu0 %v2856_v20  ;;  %1840 = vmatprep.subr.bf16.mxu1 %v2859_v21  ;;  %v2938_v20 = vld [vmem:[#allocation2 + $0x440] ss:$16 sps:$4 sm:$0xff]   ;;  %v2941_v21 = vld [vmem:[#allocation2 + $0x448] ss:$16 sps:$4 sm:$0xff]  }
  0x65   :  { %1677 = vmatpush1.bf16.msra.mxu0 %v2854_v22  ;;  %1841 = vmatpush1.bf16.msra.mxu1 %v2857_v23  ;;  %v2946_v22 = vld [vmem:[#allocation2 + $0x464] ss:$16 sps:$4 sm:$0xff]   ;;  %v2949_v23 = vld [vmem:[#allocation2 + $0x46c] ss:$16 sps:$4 sm:$0xff]  }
  0x66   :  { %1678 = vmatprep.subr.bf16.mxu0 %v2862_v24  ;;  %1842 = vmatprep.subr.bf16.mxu1 %v2865_v25  ;;  %v2944_v24 = vld [vmem:[#allocation2 + $0x460] ss:$16 sps:$4 sm:$0xff]   ;;  %v2947_v25 = vld [vmem:[#allocation2 + $0x468] ss:$16 sps:$4 sm:$0xff]  }
  0x69   :  { %1679 = vmatpush1.bf16.msra.mxu0 %v2860_v26  ;;  %1843 = vmatpush1.bf16.msra.mxu1 %v2863_v27  ;;  %v2952_v26 = vld [vmem:[#allocation2 + $0x484] ss:$16 sps:$4 sm:$0xff]   ;;  %v2955_v27 = vld [vmem:[#allocation2 + $0x48c] ss:$16 sps:$4 sm:$0xff]  }
  0x6a   :  { %1680 = vmatprep.subr.bf16.mxu0 %v2868_v28  ;;  %1844 = vmatprep.subr.bf16.mxu1 %v2871_v29  ;;  %v2950_v28 = vld [vmem:[#allocation2 + $0x480] ss:$16 sps:$4 sm:$0xff]   ;;  %v2953_v29 = vld [vmem:[#allocation2 + $0x488] ss:$16 sps:$4 sm:$0xff]  }
  0x6d   :  { %1681 = vmatpush1.bf16.msra.mxu0 %v2866_v31  ;;  %1845 = vmatpush1.bf16.msra.mxu1 %v2869_v33  ;;  %v2961_v31 = vld [vmem:[#allocation2 + $0x4ac] ss:$16 sps:$4 sm:$0xff]   ;;  %v2959_v33 = vld [vmem:[#allocation2 + $0x4a8] ss:$16 sps:$4 sm:$0xff]  }
  0x6e   :  { %1682 = vmatprep.subr.bf16.mxu0 %v2874_v34  ;;  %1846 = vmatprep.subr.bf16.mxu1 %v2877_v35  ;;  %v2964_v34 = vld [vmem:[#allocation2 + $0x4c4] ss:$16 sps:$4 sm:$0xff]   ;;  %v2967_v35 = vld [vmem:[#allocation2 + $0x4cc] ss:$16 sps:$4 sm:$0xff]  }
  0x71   :  { %1683 = vmatpush1.bf16.msra.mxu0 %v2872_v36  ;;  %1847 = vmatpush1.bf16.msra.mxu1 %v2875_v37  ;;  %v2962_v36 = vld [vmem:[#allocation2 + $0x4c0] ss:$16 sps:$4 sm:$0xff]   ;;  %v2965_v37 = vld [vmem:[#allocation2 + $0x4c8] ss:$16 sps:$4 sm:$0xff]  }
  0x72   :  { %1684 = vmatprep.subr.bf16.mxu0 %v2880_v38  ;;  %1848 = vmatprep.subr.bf16.mxu1 %v2883_v39  ;;  %v2970_v38 = vld [vmem:[#allocation2 + $0x4e4] ss:$16 sps:$4 sm:$0xff]   ;;  %v2973_v39 = vld [vmem:[#allocation2 + $0x4ec] ss:$16 sps:$4 sm:$0xff]  }
  0x75   :  { %1685 = vmatpush1.bf16.msra.mxu0 %v2878_v40  ;;  %1849 = vmatpush1.bf16.msra.mxu1 %v2881_v41  ;;  %v2968_v40 = vld [vmem:[#allocation2 + $0x4e0] ss:$16 sps:$4 sm:$0xff]   ;;  %v2971_v41 = vld [vmem:[#allocation2 + $0x4e8] ss:$16 sps:$4 sm:$0xff]  }
  0x76   :  { %1686 = vmatprep.subr.bf16.mxu0 %v2886_v42  ;;  %1850 = vmatprep.subr.bf16.mxu1 %v2889_v43  ;;  %v2976_v42 = vld [vmem:[#allocation2 + $0x504] ss:$16 sps:$4 sm:$0xff]   ;;  %v2979_v43 = vld [vmem:[#allocation2 + $0x50c] ss:$16 sps:$4 sm:$0xff]  }
  0x79   :  { %1687 = vmatpush1.bf16.msra.mxu0 %v2884_v44  ;;  %1851 = vmatpush1.bf16.msra.mxu1 %v2887_v45  ;;  %v2974_v44 = vld [vmem:[#allocation2 + $0x500] ss:$16 sps:$4 sm:$0xff]   ;;  %v2977_v45 = vld [vmem:[#allocation2 + $0x508] ss:$16 sps:$4 sm:$0xff]  }
  0x7a   :  { %1688 = vmatprep.subr.bf16.mxu0 %v2892_v46  ;;  %1852 = vmatprep.subr.bf16.mxu1 %v2895_v47  ;;  %v2982_v46 = vld [vmem:[#allocation2 + $0x524] ss:$16 sps:$4 sm:$0xff]   ;;  %v2985_v47 = vld [vmem:[#allocation2 + $0x52c] ss:$16 sps:$4 sm:$0xff]  }
  0x7d   :  { %1689 = vmatpush1.bf16.msra.mxu0 %v2890_v48  ;;  %1853 = vmatpush1.bf16.msra.mxu1 %v2893_v49  ;;  %v2980_v48 = vld [vmem:[#allocation2 + $0x520] ss:$16 sps:$4 sm:$0xff]   ;;  %v2983_v49 = vld [vmem:[#allocation2 + $0x528] ss:$16 sps:$4 sm:$0xff]  }
  0x7e   :  { %1690 = vmatprep.subr.bf16.mxu0 %v2898_v50  ;;  %1854 = vmatprep.subr.bf16.mxu1 %v2901_v51  ;;  %v2988_v50 = vld [vmem:[#allocation2 + $0x544] ss:$16 sps:$4 sm:$0xff]   ;;  %v2991_v51 = vld [vmem:[#allocation2 + $0x54c] ss:$16 sps:$4 sm:$0xff]  }
  0x81   :  { %1691 = vmatpush1.bf16.msra.mxu0 %v2896_v52  ;;  %1855 = vmatpush1.bf16.msra.mxu1 %v2899_v53  ;;  %v2986_v52 = vld [vmem:[#allocation2 + $0x540] ss:$16 sps:$4 sm:$0xff]   ;;  %v2989_v53 = vld [vmem:[#allocation2 + $0x548] ss:$16 sps:$4 sm:$0xff]  }
  0x82   :  { %1692 = vmatprep.subr.bf16.mxu0 %v2904_v54  ;;  %1856 = vmatprep.subr.bf16.mxu1 %v2907_v55  ;;  %v2994_v54 = vld [vmem:[#allocation2 + $0x564] ss:$16 sps:$4 sm:$0xff]   ;;  %v2997_v55 = vld [vmem:[#allocation2 + $0x56c] ss:$16 sps:$4 sm:$0xff]  }
  0x85   :  { %1693 = vmatpush1.bf16.msra.mxu0 %v2902_v56  ;;  %1857 = vmatpush1.bf16.msra.mxu1 %v2905_v57  ;;  %v2992_v56 = vld [vmem:[#allocation2 + $0x560] ss:$16 sps:$4 sm:$0xff]   ;;  %v2995_v57 = vld [vmem:[#allocation2 + $0x568] ss:$16 sps:$4 sm:$0xff]  }
  0x86   :  { %1694 = vmatprep.subr.bf16.mxu0 %v2910_v58  ;;  %1858 = vmatprep.subr.bf16.mxu1 %v2913_v59  ;;  %v3000_v58 = vld [vmem:[#allocation2 + $0x584] ss:$16 sps:$4 sm:$0xff]   ;;  %v3003_v59 = vld [vmem:[#allocation2 + $0x58c] ss:$16 sps:$4 sm:$0xff]  }
  0x89   :  { %1695 = vmatpush1.bf16.msra.mxu0 %v2908_v60  ;;  %1859 = vmatpush1.bf16.msra.mxu1 %v2911_v61  ;;  %v2998_v60 = vld [vmem:[#allocation2 + $0x580] ss:$16 sps:$4 sm:$0xff]   ;;  %v3001_v61 = vld [vmem:[#allocation2 + $0x588] ss:$16 sps:$4 sm:$0xff]  }
  0x8a   :  { %1696 = vmatprep.subr.bf16.mxu0 %v2916_v62  ;;  %1860 = vmatprep.subr.bf16.mxu1 %v2919_v63  ;;  %v3006_v62 = vld [vmem:[#allocation2 + $0x5a4] ss:$16 sps:$4 sm:$0xff]   ;;  %v3009_v63 = vld [vmem:[#allocation2 + $0x5ac] ss:$16 sps:$4 sm:$0xff]  }
  0x8d   :  { %1697 = vmatpush1.bf16.msra.mxu0 %v2914_v0  ;;  %1861 = vmatpush1.bf16.msra.mxu1 %v2917_v1  ;;  %v3004_v0 = vld [vmem:[#allocation2 + $0x5a0] ss:$16 sps:$4 sm:$0xff]   ;;  %v3007_v1 = vld [vmem:[#allocation2 + $0x5a8] ss:$16 sps:$4 sm:$0xff]  }
  0x8e   :  { %1698 = vmatprep.subr.bf16.mxu0 %v2922_v2  ;;  %1862 = vmatprep.subr.bf16.mxu1 %v2925_v3  ;;  %v3012_v2 = vld [vmem:[#allocation2 + $0x5c4] ss:$16 sps:$4 sm:$0xff]   ;;  %v3015_v3 = vld [vmem:[#allocation2 + $0x5cc] ss:$16 sps:$4 sm:$0xff]  }
  0x91   :  { %1699 = vmatpush1.bf16.msra.mxu0 %v2920_v4  ;;  %1863 = vmatpush1.bf16.msra.mxu1 %v2923_v5  ;;  %v3010_v4 = vld [vmem:[#allocation2 + $0x5c0] ss:$16 sps:$4 sm:$0xff]   ;;  %v3013_v5 = vld [vmem:[#allocation2 + $0x5c8] ss:$16 sps:$4 sm:$0xff]  }
  0x92   :  { %1709 = vmatprep.subr.bf16.mxu0 %v2928_v6  ;;  %1873 = vmatprep.subr.bf16.mxu1 %v2931_v8  ;;  %v3018_v6 = vld [vmem:[#allocation2 + $0x5e4] ss:$16 sps:$4 sm:$0xff]   ;;  %v3016_v8 = vld [vmem:[#allocation2 + $0x5e0] ss:$16 sps:$4 sm:$0xff]  }
  0x94   :  { %1701 = vmatmul.mubr.bf16.vlgmr.msra.gmra.mrb[0].mxu0 %v54_v11  ;;  %1865 = vmatmul.mubr.bf16.vlgmr.msra.gmra.mrb[0].mxu1 %v54_v11  ;;  %v48_v11 = vld [vmem:[%s3412_s0 + $0x20] sm:$0xff] }
  0x95   :  { %1710 = vmatpush1.bf16.msra.mxu0 %v2926_v9  ;;  %1874 = vmatpush1.bf16.msra.mxu1 %v2929_v10  ;;  %v3019_v9 = vld [vmem:[#allocation2 + $0x5e8] ss:$16 sps:$4 sm:$0xff]   ;;  %v3024_v10 = vld [vmem:[#allocation2 + $0x604] ss:$16 sps:$4 sm:$0xff]   ;;  %v56_v14 = vpack.c.bf16 %v48_v11, %v48_v11  ;;  %v3117_v11 = vld [vmem:[#allocation2 + $0x7ec] ss:$16 sps:$4 sm:$0xff]  }
  0x96   :  { %1711 = vmatprep.subr.bf16.mxu0 %v2934_v12  ;;  %1875 = vmatprep.subr.bf16.mxu1 %v2937_v13  ;;  %v3027_v12 = vld [vmem:[#allocation2 + $0x60c] ss:$16 sps:$4 sm:$0xff]   ;;  %v3022_v13 = vld [vmem:[#allocation2 + $0x600] ss:$16 sps:$4 sm:$0xff]  }
  0x97   :  { %1741 = vmatprep.mubr.bf16.mxu0 %v57_v15  ;;  %1905 = vmatprep.mubr.bf16.mxu1 %v57_v15  ;;  %v51_v15 = vld [vmem:[%s3412_s0 + $0x38] sm:$0xff] }
  0x99   :  { %1712 = vmatpush1.bf16.msra.mxu0 %v2932_v16  ;;  %1876 = vmatpush1.bf16.msra.mxu1 %v2935_v17  ;;  %v3025_v16 = vld [vmem:[#allocation2 + $0x608] ss:$16 sps:$4 sm:$0xff]   ;;  %v3030_v17 = vld [vmem:[#allocation2 + $0x624] ss:$16 sps:$4 sm:$0xff]  }
  0x9a   :  { %1713 = vmatprep.subr.bf16.mxu0 %v2940_v18  ;;  %1877 = vmatprep.subr.bf16.mxu1 %v2943_v19  ;;  %v3033_v18 = vld [vmem:[#allocation2 + $0x62c] ss:$16 sps:$4 sm:$0xff]   ;;  %v3028_v19 = vld [vmem:[#allocation2 + $0x620] ss:$16 sps:$4 sm:$0xff]  }
  0x9d   :  { %1714 = vmatpush1.bf16.msra.mxu0 %v2938_v20  ;;  %1878 = vmatpush1.bf16.msra.mxu1 %v2941_v21  ;;  %v3031_v20 = vld [vmem:[#allocation2 + $0x628] ss:$16 sps:$4 sm:$0xff]   ;;  %v59_v21 = vpack.c.bf16 %v51_v15, %v51_v15  ;;  %v3118_v15 = vld [vmem:[%s3415_s3 + $0x40] sm:$0xff]  }
  0x9e   :  { %1715 = vmatprep.subr.bf16.mxu0 %v2946_v22  ;;  %1879 = vmatprep.subr.bf16.mxu1 %v2949_v23  ;;  %v3036_v22 = vld [vmem:[#allocation2 + $0x644] ss:$16 sps:$4 sm:$0xff]   ;;  %v3039_v23 = vld [vmem:[#allocation2 + $0x64c] ss:$16 sps:$4 sm:$0xff]  }
  0xa1   :  { %1716 = vmatpush1.bf16.msra.mxu0 %v2944_v24  ;;  %1880 = vmatpush1.bf16.msra.mxu1 %v2947_v25  ;;  %v3034_v24 = vld [vmem:[#allocation2 + $0x640] ss:$16 sps:$4 sm:$0xff]   ;;  %v3037_v25 = vld [vmem:[#allocation2 + $0x648] ss:$16 sps:$4 sm:$0xff]  }
  0xa2   :  { %1717 = vmatprep.subr.bf16.mxu0 %v2952_v26  ;;  %1881 = vmatprep.subr.bf16.mxu1 %v2955_v27  ;;  %v3042_v26 = vld [vmem:[#allocation2 + $0x664] ss:$16 sps:$4 sm:$0xff]   ;;  %v3045_v27 = vld [vmem:[#allocation2 + $0x66c] ss:$16 sps:$4 sm:$0xff]  }
  0xa5   :  { %1718 = vmatpush1.bf16.msra.mxu0 %v2950_v28  ;;  %1882 = vmatpush1.bf16.msra.mxu1 %v2953_v29  ;;  %v3040_v28 = vld [vmem:[#allocation2 + $0x660] ss:$16 sps:$4 sm:$0xff]   ;;  %v3043_v29 = vld [vmem:[#allocation2 + $0x668] ss:$16 sps:$4 sm:$0xff]  }
  0xa6   :  { %1719 = vmatprep.subr.bf16.mxu0 %v2958_v30  ;;  %1883 = vmatprep.subr.bf16.mxu1 %v2961_v31  ;;  %v3048_v30 = vld [vmem:[#allocation2 + $0x684] ss:$16 sps:$4 sm:$0xff]   ;;  %v3051_v31 = vld [vmem:[#allocation2 + $0x68c] ss:$16 sps:$4 sm:$0xff]  }
  0xa9   :  { %1720 = vmatpush1.bf16.msra.mxu0 %v2956_v32  ;;  %1884 = vmatpush1.bf16.msra.mxu1 %v2959_v33  ;;  %v3046_v32 = vld [vmem:[#allocation2 + $0x680] ss:$16 sps:$4 sm:$0xff]   ;;  %v3049_v33 = vld [vmem:[#allocation2 + $0x688] ss:$16 sps:$4 sm:$0xff]  }
  0xaa   :  { %1721 = vmatprep.subr.bf16.mxu0 %v2964_v34  ;;  %1885 = vmatprep.subr.bf16.mxu1 %v2967_v35  ;;  %v3054_v34 = vld [vmem:[#allocation2 + $0x6a4] ss:$16 sps:$4 sm:$0xff]   ;;  %v3057_v35 = vld [vmem:[#allocation2 + $0x6ac] ss:$16 sps:$4 sm:$0xff]  }
  0xad   :  { %1722 = vmatpush1.bf16.msra.mxu0 %v2962_v36  ;;  %1886 = vmatpush1.bf16.msra.mxu1 %v2965_v37  ;;  %v3052_v36 = vld [vmem:[#allocation2 + $0x6a0] ss:$16 sps:$4 sm:$0xff]   ;;  %v3055_v37 = vld [vmem:[#allocation2 + $0x6a8] ss:$16 sps:$4 sm:$0xff]  }
  0xae   :  { %1723 = vmatprep.subr.bf16.mxu0 %v2970_v38  ;;  %1887 = vmatprep.subr.bf16.mxu1 %v2973_v39  ;;  %v3060_v38 = vld [vmem:[#allocation2 + $0x6c4] ss:$16 sps:$4 sm:$0xff]   ;;  %v3063_v39 = vld [vmem:[#allocation2 + $0x6cc] ss:$16 sps:$4 sm:$0xff]  }
  0xb1   :  { %1724 = vmatpush1.bf16.msra.mxu0 %v2968_v40  ;;  %1888 = vmatpush1.bf16.msra.mxu1 %v2971_v41  ;;  %v3058_v40 = vld [vmem:[#allocation2 + $0x6c0] ss:$16 sps:$4 sm:$0xff]   ;;  %v3061_v41 = vld [vmem:[#allocation2 + $0x6c8] ss:$16 sps:$4 sm:$0xff]  }
  0xb2   :  { %1725 = vmatprep.subr.bf16.mxu0 %v2976_v42  ;;  %1889 = vmatprep.subr.bf16.mxu1 %v2979_v43  ;;  %v3066_v42 = vld [vmem:[#allocation2 + $0x6e4] ss:$16 sps:$4 sm:$0xff]   ;;  %v3069_v43 = vld [vmem:[#allocation2 + $0x6ec] ss:$16 sps:$4 sm:$0xff]  }
  0xb5   :  { %1726 = vmatpush1.bf16.msra.mxu0 %v2974_v44  ;;  %1890 = vmatpush1.bf16.msra.mxu1 %v2977_v45  ;;  %v3064_v44 = vld [vmem:[#allocation2 + $0x6e0] ss:$16 sps:$4 sm:$0xff]   ;;  %v3067_v45 = vld [vmem:[#allocation2 + $0x6e8] ss:$16 sps:$4 sm:$0xff]  }
  0xb6   :  { %1727 = vmatprep.subr.bf16.mxu0 %v2982_v46  ;;  %1891 = vmatprep.subr.bf16.mxu1 %v2985_v47  ;;  %v3072_v46 = vld [vmem:[#allocation2 + $0x704] ss:$16 sps:$4 sm:$0xff]   ;;  %v3075_v47 = vld [vmem:[#allocation2 + $0x70c] ss:$16 sps:$4 sm:$0xff]  }
  0xb9   :  { %1728 = vmatpush1.bf16.msra.mxu0 %v2980_v48  ;;  %1892 = vmatpush1.bf16.msra.mxu1 %v2983_v49  ;;  %v3070_v48 = vld [vmem:[#allocation2 + $0x700] ss:$16 sps:$4 sm:$0xff]   ;;  %v3073_v49 = vld [vmem:[#allocation2 + $0x708] ss:$16 sps:$4 sm:$0xff]  }
  0xba   :  { %1729 = vmatprep.subr.bf16.mxu0 %v2988_v50  ;;  %1893 = vmatprep.subr.bf16.mxu1 %v2991_v51  ;;  %v3078_v50 = vld [vmem:[#allocation2 + $0x724] ss:$16 sps:$4 sm:$0xff]   ;;  %v3081_v51 = vld [vmem:[#allocation2 + $0x72c] ss:$16 sps:$4 sm:$0xff]  }
  0xbd   :  { %1730 = vmatpush1.bf16.msra.mxu0 %v2986_v52  ;;  %1894 = vmatpush1.bf16.msra.mxu1 %v2989_v53  ;;  %v3076_v52 = vld [vmem:[#allocation2 + $0x720] ss:$16 sps:$4 sm:$0xff]   ;;  %v3079_v53 = vld [vmem:[#allocation2 + $0x728] ss:$16 sps:$4 sm:$0xff]  }
  0xbe   :  { %1731 = vmatprep.subr.bf16.mxu0 %v2994_v54  ;;  %1895 = vmatprep.subr.bf16.mxu1 %v2997_v55  ;;  %v3084_v54 = vld [vmem:[#allocation2 + $0x744] ss:$16 sps:$4 sm:$0xff]   ;;  %v3087_v55 = vld [vmem:[#allocation2 + $0x74c] ss:$16 sps:$4 sm:$0xff]  }
  0xc1   :  { %1732 = vmatpush1.bf16.msra.mxu0 %v2992_v56  ;;  %1896 = vmatpush1.bf16.msra.mxu1 %v2995_v57  ;;  %v3082_v56 = vld [vmem:[#allocation2 + $0x740] ss:$16 sps:$4 sm:$0xff]   ;;  %v3085_v57 = vld [vmem:[#allocation2 + $0x748] ss:$16 sps:$4 sm:$0xff]  }
  0xc2   :  { %1733 = vmatprep.subr.bf16.mxu0 %v3000_v58  ;;  %1897 = vmatprep.subr.bf16.mxu1 %v3003_v59  ;;  %v3090_v58 = vld [vmem:[#allocation2 + $0x764] ss:$16 sps:$4 sm:$0xff]   ;;  %v3093_v59 = vld [vmem:[#allocation2 + $0x76c] ss:$16 sps:$4 sm:$0xff]  }
  0xc5   :  { %1734 = vmatpush1.bf16.msra.mxu0 %v2998_v60  ;;  %1898 = vmatpush1.bf16.msra.mxu1 %v3001_v61  ;;  %v3088_v60 = vld [vmem:[#allocation2 + $0x760] ss:$16 sps:$4 sm:$0xff]   ;;  %v3091_v61 = vld [vmem:[#allocation2 + $0x768] ss:$16 sps:$4 sm:$0xff]  }
  0xc6   :  { %1735 = vmatprep.subr.bf16.mxu0 %v3006_v62  ;;  %1899 = vmatprep.subr.bf16.mxu1 %v3009_v63  ;;  %v3096_v62 = vld [vmem:[#allocation2 + $0x784] ss:$16 sps:$4 sm:$0xff]   ;;  %v3099_v63 = vld [vmem:[#allocation2 + $0x78c] ss:$16 sps:$4 sm:$0xff]  }
  0xc9   :  { %1736 = vmatpush1.bf16.msra.mxu0 %v3004_v0  ;;  %1900 = vmatpush1.bf16.msra.mxu1 %v3007_v1  ;;  %v3094_v0 = vld [vmem:[#allocation2 + $0x780] ss:$16 sps:$4 sm:$0xff]   ;;  %v3097_v1 = vld [vmem:[#allocation2 + $0x788] ss:$16 sps:$4 sm:$0xff]  }
  0xca   :  { %1737 = vmatprep.subr.bf16.mxu0 %v3012_v2  ;;  %1901 = vmatprep.subr.bf16.mxu1 %v3015_v3  ;;  %v3102_v2 = vld [vmem:[#allocation2 + $0x7a4] ss:$16 sps:$4 sm:$0xff]   ;;  %v3105_v3 = vld [vmem:[#allocation2 + $0x7ac] ss:$16 sps:$4 sm:$0xff]  }
  0xcd   :  { %1738 = vmatpush1.bf16.msra.mxu0 %v3010_v4  ;;  %1902 = vmatpush1.bf16.msra.mxu1 %v3013_v5  ;;  %v3100_v4 = vld [vmem:[#allocation2 + $0x7a0] ss:$16 sps:$4 sm:$0xff]   ;;  %v3103_v5 = vld [vmem:[#allocation2 + $0x7a8] ss:$16 sps:$4 sm:$0xff]  }
  0xce   :  { %1739 = vmatprep.subr.bf16.mxu0 %v3018_v6  ;;  %1903 = vmatprep.subr.bf16.mxu1 %v3021_v7  ;;  %v3108_v6 = vld [vmem:[#allocation2 + $0x7c4] ss:$16 sps:$4 sm:$0xff]   ;;  %v3111_v7 = vld [vmem:[#allocation2 + $0x7cc] ss:$16 sps:$4 sm:$0xff]  }
  0xd1   :  { %1740 = vmatpush1.bf16.msra.mxu0 %v3016_v8  ;;  %1904 = vmatpush1.bf16.msra.mxu1 %v3019_v9  ;;  %v3106_v8 = vld [vmem:[#allocation2 + $0x7c0] ss:$16 sps:$4 sm:$0xff]   ;;  %v3109_v9 = vld [vmem:[#allocation2 + $0x7c8] ss:$16 sps:$4 sm:$0xff]  }
  0xd2   :  { %1750 = vmatprep.subr.bf16.mxu0 %v3024_v10  ;;  %1914 = vmatprep.subr.bf16.mxu1 %v3027_v12  ;;  %v3114_v10 = vld [vmem:[#allocation2 + $0x7e4] ss:$16 sps:$4 sm:$0xff]   ;;  %v3112_v12 = vld [vmem:[#allocation2 + $0x7e0] ss:$16 sps:$4 sm:$0xff]  }
  0xd4   :  { %1742 = vmatmul.mubr.bf16.vlgmr.msra.gmra.mrb[0].mxu0 %v56_v14  ;;  %1906 = vmatmul.mubr.bf16.vlgmr.msra.gmra.mrb[0].mxu1 %v56_v14  ;;  %v50_v14 = vld [vmem:[%s3412_s0 + $0x30] sm:$0xff] }
  0xd5   :  { %1751 = vmatpush1.bf16.msra.mxu0 %v3022_v13  ;;  %1915 = vmatpush1.bf16.msra.mxu1 %v3025_v16  ;;  %v3115_v13 = vld [vmem:[#allocation2 + $0x7e8] ss:$16 sps:$4 sm:$0xff]   ;;  %v3119_v16 = vld [vmem:[%s3415_s3 + $0xc0] sm:$0xff]  }
  0xd6   :  { %1752 = vmatprep.subr.bf16.mxu0 %v3030_v17  ;;  %1916 = vmatprep.subr.bf16.mxu1 %v3033_v18  ;;  %v58_v17 = vpack.c.bf16 %v50_v14, %v50_v14  ;;  %v3120_v18 = vld [vmem:[%s3415_s3] sm:$0xff]  }
  0xd7   :  { %1782 = vmatprep.mubr.bf16.mxu0 %v59_v21  ;;  %1946 = vmatprep.mubr.bf16.mxu1 %v59_v21  ;;  %v3123_v21 = vld [vmem:[%s3415_s3 + $0xc8] sm:$0xff]  }
  0xd9   :  { %1753 = vmatpush1.bf16.msra.mxu0 %v3028_v19  ;;  %1917 = vmatpush1.bf16.msra.mxu1 %v3031_v20  ;;  %v3121_v19 = vld [vmem:[%s3415_s3 + $0x80] sm:$0xff]   ;;  %v3122_v20 = vld [vmem:[%s3415_s3 + $0x48] sm:$0xff]  }
  0xda   :  { %1754 = vmatprep.subr.bf16.mxu0 %v3036_v22  ;;  %1918 = vmatprep.subr.bf16.mxu1 %v3039_v23  ;;  %v3124_v22 = vld [vmem:[%s3415_s3 + $0x8] sm:$0xff]  }
  0xdb   :  { %v3125_v23 = vld [vmem:[%s3415_s3 + $0x88] sm:$0xff]  }
  0xdd   :  { %1755 = vmatpush1.bf16.msra.mxu0 %v3034_v24  ;;  %1919 = vmatpush1.bf16.msra.mxu1 %v3037_v25  ;;  %v3126_v24 = vld [vmem:[%s3415_s3 + $0x50] sm:$0xff]  }
  0xde   :  { %1756 = vmatprep.subr.bf16.mxu0 %v3042_v26  ;;  %1920 = vmatprep.subr.bf16.mxu1 %v3045_v27  ;;  %v3127_v25 = vld [vmem:[%s3415_s3 + $0xd0] sm:$0xff]  }
  0xdf   :  { %v3128_v26 = vld [vmem:[%s3415_s3 + $0x10] sm:$0xff]  }
  0xe0   :  { %v3129_v27 = vld [vmem:[%s3415_s3 + $0x90] sm:$0xff]  }
  0xe1   :  { %1757 = vmatpush1.bf16.msra.mxu0 %v3040_v28  ;;  %1921 = vmatpush1.bf16.msra.mxu1 %v3043_v29  ;;  %v3130_v28 = vld [vmem:[%s3415_s3 + $0x58] sm:$0xff]  }
  0xe2   :  { %1758 = vmatprep.subr.bf16.mxu0 %v3048_v30  ;;  %1922 = vmatprep.subr.bf16.mxu1 %v3051_v31  ;;  %v3131_v29 = vld [vmem:[%s3415_s3 + $0xd8] sm:$0xff]  }
  0xe3   :  { %v3132_v30 = vld [vmem:[%s3415_s3 + $0x18] sm:$0xff]  }
  0xe4   :  { %v3133_v31 = vld [vmem:[%s3415_s3 + $0x98] sm:$0xff]  }
  0xe5   :  { %1759 = vmatpush1.bf16.msra.mxu0 %v3046_v32  ;;  %1923 = vmatpush1.bf16.msra.mxu1 %v3049_v33  ;;  %v3134_v32 = vld [vmem:[%s3415_s3 + $0x60] sm:$0xff]  }
  0xe6   :  { %1760 = vmatprep.subr.bf16.mxu0 %v3054_v34  ;;  %1924 = vmatprep.subr.bf16.mxu1 %v3057_v35  ;;  %v3135_v33 = vld [vmem:[%s3415_s3 + $0xe0] sm:$0xff]  }
  0xe7   :  { %v3136_v34 = vld [vmem:[%s3415_s3 + $0x20] sm:$0xff]  }
  0xe8   :  { %v3137_v35 = vld [vmem:[%s3415_s3 + $0xa0] sm:$0xff]  }
  0xe9   :  { %1761 = vmatpush1.bf16.msra.mxu0 %v3052_v36  ;;  %1925 = vmatpush1.bf16.msra.mxu1 %v3055_v37  ;;  %v3138_v36 = vld [vmem:[%s3415_s3 + $0x68] sm:$0xff]  }
  0xea   :  { %1762 = vmatprep.subr.bf16.mxu0 %v3060_v38  ;;  %1926 = vmatprep.subr.bf16.mxu1 %v3063_v39  ;;  %v3139_v37 = vld [vmem:[%s3415_s3 + $0xe8] sm:$0xff]  }
  0xeb   :  { %v3140_v38 = vld [vmem:[%s3415_s3 + $0x28] sm:$0xff]  }
  0xec   :  { %v3141_v39 = vld [vmem:[%s3415_s3 + $0xa8] sm:$0xff]  }
  0xed   :  { %1763 = vmatpush1.bf16.msra.mxu0 %v3058_v40  ;;  %1927 = vmatpush1.bf16.msra.mxu1 %v3061_v41  ;;  %v3142_v40 = vld [vmem:[%s3415_s3 + $0x70] sm:$0xff]  }
  0xee   :  { %1764 = vmatprep.subr.bf16.mxu0 %v3066_v42  ;;  %1928 = vmatprep.subr.bf16.mxu1 %v3069_v43  ;;  %v3143_v41 = vld [vmem:[%s3415_s3 + $0xf0] sm:$0xff]  }
  0xef   :  { %v3144_v42 = vld [vmem:[%s3415_s3 + $0x30] sm:$0xff]  }
  0xf0   :  { %v3145_v43 = vld [vmem:[%s3415_s3 + $0xb0] sm:$0xff]  }
  0xf1   :  { %1765 = vmatpush1.bf16.msra.mxu0 %v3064_v44  ;;  %1929 = vmatpush1.bf16.msra.mxu1 %v3067_v45  ;;  %v3146_v44 = vld [vmem:[%s3415_s3 + $0x78] sm:$0xff]  }
  0xf2   :  { %1766 = vmatprep.subr.bf16.mxu0 %v3072_v46  ;;  %1930 = vmatprep.subr.bf16.mxu1 %v3075_v47  ;;  %v3147_v45 = vld [vmem:[%s3415_s3 + $0xf8] sm:$0xff]  }
  0xf3   :  { %v3148_v46 = vld [vmem:[%s3415_s3 + $0x38] sm:$0xff]  }
  0xf4   :  { %v3149_v47 = vld [vmem:[%s3415_s3 + $0xb8] sm:$0xff]  }
  0xf5   :  { %1767 = vmatpush1.bf16.msra.mxu0 %v3070_v48  ;;  %1931 = vmatpush1.bf16.msra.mxu1 %v3073_v49  ;;  %v2316_v48 = vld [vmem:[%s3418_s6] sm:$0xff]  ;;  %v327_v49 = vlaneseq  ;;  %s3205_s6 = smov [#allocation5]  }
  0xf6   :  { %1768 = vmatprep.subr.bf16.mxu0 %v3078_v50  ;;  %1932 = vmatprep.subr.bf16.mxu1 %v3081_v51  ;;  %s2353_s10 = sshll.u32 %s3205_s6, 4  ;;  %s2354_s10 = int_to_ptr.vmem [resolvable:$true] %s2353_s10 }
  0xf7   :  { %2318 = vrot.lane.b32.xlu1 %v2316_v48, %s3203_s28  ;;  %v328_v50 = vshrl.u32 %v327_v49, 7  ;;  %s3174_s11 = scalar_lea.vmem %s2354_s10, 128  ;;  %p3179_p9 = scmp.lt.s32.totalorder %s2354_s10, %s2354_s10 }
  0xf8   :  { %p3175_p8 = scmp.ne.s32.totalorder %s2354_s10, %s3174_s11  ;;  %p3180_p10 = scmp.lt.s32.totalorder %s3174_s11, %s3174_s11 }
  0xf9   :  { %1769 = vmatpush1.bf16.msra.mxu0 %v3076_v52  ;;  %1933 = vmatpush1.bf16.msra.mxu1 %v3079_v53  ;;  %v329_v51 = vsub.s32 0, %v328_v50  ;;  %v337_v52 = vsub.s32 2, %v328_v50  ;;  %v316_v53 = vld [vmem:[%s3417_s5] sm:$0xff] }
  0xfa   :  { %1770 = vmatprep.subr.bf16.mxu0 %v3084_v54  ;;  %1934 = vmatprep.subr.bf16.mxu1 %v3087_v55  ;;  %v325_v54 = vld [vmem:[%s3414_s2] sm:$0xf]  ;;  %v333_v55 = vsub.s32 1, %v328_v50  ;;  %p3181_p11 = por %p3180_p10, %p3179_p9 }
  0xfc   :  { %p3182_p12 = pnand %p3181_p11, %p3175_p8 }
  0xfd   :  { %1771 = vmatpush1.bf16.msra.mxu0 %v3082_v56  ;;  %1935 = vmatpush1.bf16.msra.mxu1 %v3085_v57  ;;  %v341_v56 = vsub.s32 3, %v328_v50  ;;  %v317_v57 = vunpack.c.0.s8 %v316_v53 }
  0xfe   :  { %1772 = vmatprep.subr.bf16.mxu0 %v3090_v58  ;;  %1936 = vmatprep.subr.bf16.mxu1 %v3093_v59  ;;  %v330_v58 = vrot.slane %v325_v54, %v329_v51  ;;  %v319_v59 = vunpack.c.2.s8 %v316_v53 }
 0x101   :  { %1773 = vmatpush1.bf16.msra.mxu0 %v3088_v60  ;;  %1937 = vmatpush1.bf16.msra.mxu1 %v3091_v61  ;;  %v338_v60 = vrot.slane %v325_v54, %v337_v52  ;;  %v318_v61 = vunpack.c.1.s8 %v316_v53 }
 0x102   :  { %1774 = vmatprep.subr.bf16.mxu0 %v3096_v62  ;;  %1938 = vmatprep.subr.bf16.mxu1 %v3099_v63  ;;  %v334_v62 = vrot.slane %v325_v54, %v333_v55  ;;  %v320_v63 = vunpack.c.3.s8 %v316_v53 }
 0x105   :  { %1775 = vmatpush1.bf16.msra.mxu0 %v3094_v0  ;;  %1939 = vmatpush1.bf16.msra.mxu1 %v3097_v1  ;;  %v342_v0 = vrot.slane %v325_v54, %v341_v56 }
 0x106   :  { %1776 = vmatprep.subr.bf16.mxu0 %v3102_v2  ;;  %1940 = vmatprep.subr.bf16.mxu1 %v3105_v3  ;;  %v321_v3 = vcvt.s32.f32 %v317_v57 }
 0x109   :  { %1777 = vmatpush1.bf16.msra.mxu0 %v3100_v4  ;;  %1941 = vmatpush1.bf16.msra.mxu1 %v3103_v5  ;;  %v323_v5 = vcvt.s32.f32 %v319_v59 }
 0x10a   :  { %1778 = vmatprep.subr.bf16.mxu0 %v3108_v6  ;;  %1942 = vmatprep.subr.bf16.mxu1 %v3111_v7 }
 0x10d   :  { %1779 = vmatpush1.bf16.msra.mxu0 %v3106_v8  ;;  %1943 = vmatpush1.bf16.msra.mxu1 %v3109_v9  ;;  %v322_v9 = vcvt.s32.f32 %v318_v61 }
 0x10e   :  { %1780 = vmatprep.subr.bf16.mxu0 %v3114_v10  ;;  %1944 = vmatprep.subr.bf16.mxu1 %v3117_v11  ;;  %v324_v11 = vcvt.s32.f32 %v320_v63 }
 0x111   :  { %1781 = vmatpush1.bf16.msra.mxu0 %v3112_v12  ;;  %1945 = vmatpush1.bf16.msra.mxu1 %v3115_v13 }
 0x112   :  { %2656 = vmatprep.subr.bf16.mxu0 %v3118_v15  ;;  %2678 = vmatprep.subr.bf16.mxu1 %v3119_v16 }
 0x114   :  { %1783 = vmatmul.mubr.bf16.vlgmr.msra.gmra.mrb[0].mxu0 %v58_v17  ;;  %1947 = vmatmul.mubr.bf16.vlgmr.msra.gmra.mrb[0].mxu1 %v58_v17 }
 0x115   :  { %2657 = vmatpush3.bf16.msra.mxu0 %v3120_v18  ;;  %2679 = vmatpush3.bf16.msra.mxu1 %v3121_v19 }
 0x116   :  { %2658 = vmatprep.subr.bf16.mxu0 %v3122_v20  ;;  %2680 = vmatprep.subr.bf16.mxu1 %v3123_v21 }
 0x119   :  { %2659 = vmatpush3.bf16.msra.mxu0 %v3124_v22  ;;  %2681 = vmatpush3.bf16.msra.mxu1 %v3125_v23 }
 0x11a   :  { %2660 = vmatprep.subr.bf16.mxu0 %v3126_v24  ;;  %2682 = vmatprep.subr.bf16.mxu1 %v3127_v25 }
 0x11d   :  { %2661 = vmatpush3.bf16.msra.mxu0 %v3128_v26  ;;  %2683 = vmatpush3.bf16.msra.mxu1 %v3129_v27 }
 0x11e   :  { %2662 = vmatprep.subr.bf16.mxu0 %v3130_v28  ;;  %2684 = vmatprep.subr.bf16.mxu1 %v3131_v29 }
 0x121   :  { %2663 = vmatpush3.bf16.msra.mxu0 %v3132_v30  ;;  %2685 = vmatpush3.bf16.msra.mxu1 %v3133_v31 }
 0x122   :  { %2664 = vmatprep.subr.bf16.mxu0 %v3134_v32  ;;  %2686 = vmatprep.subr.bf16.mxu1 %v3135_v33 }
 0x125   :  { %2665 = vmatpush3.bf16.msra.mxu0 %v3136_v34  ;;  %2687 = vmatpush3.bf16.msra.mxu1 %v3137_v35  ;;  %v2622_v35 = vld [vmem:[%s3416_s4] ss:$0 sm:$0xff]  ;;  %s3204_s4 = smov 120  }
 0x126   :  { %2666 = vmatprep.subr.bf16.mxu0 %v3138_v36  ;;  %2688 = vmatprep.subr.bf16.mxu1 %v3139_v37 }
 0x129   :  { %2667 = vmatpush3.bf16.msra.mxu0 %v3140_v38  ;;  %2689 = vmatpush3.bf16.msra.mxu1 %v3141_v39 }
 0x12a   :  { %2668 = vmatprep.subr.bf16.mxu0 %v3142_v40  ;;  %2690 = vmatprep.subr.bf16.mxu1 %v3143_v41 }
 0x12d   :  { %2669 = vmatpush3.bf16.msra.mxu0 %v3144_v42  ;;  %2691 = vmatpush3.bf16.msra.mxu1 %v3145_v43 }
 0x12e   :  { %2670 = vmatprep.subr.bf16.mxu0 %v3146_v44  ;;  %2692 = vmatprep.subr.bf16.mxu1 %v3147_v45 }
 0x131   :  { %2671 = vmatpush3.bf16.msra.mxu0 %v3148_v46  ;;  %2693 = vmatpush3.bf16.msra.mxu1 %v3149_v47 }
 0x169   :  { %v2319_v54 = vpop.permute.xlu1 %2318 }
 0x1e7   :  { %v1784_v1 = vpop.f32.mrb[0].mxu0  ;;  %v1948_v2 = vpop.f32.mrb[0].mxu1 }
 0x1e8   :  { %v2700_v4 = vadd.f32 %v1784_v1, %v330_v58  ;;  %v2702_v6 = vadd.f32 %v1948_v2, %v338_v60  ;;  %v1786_v7 = vpop.f32.mrb[1].mxu0  ;;  %v1950_v8 = vpop.f32.mrb[1].mxu1 }
 0x1e9   :  { %v2701_v10 = vadd.f32 %v1786_v7, %v334_v62  ;;  %v2703_v12 = vadd.f32 %v1950_v8, %v342_v0  ;;  %v1788_v13 = vpop.f32.mrb[2].mxu0  ;;  %v1952_v14 = vpop.f32.mrb[2].mxu1 }
 0x1ea   :  { %v1955_v15 = vmax.f32 %v2700_v4, 0.0  ;;  %v1957_v16 = vmax.f32 %v2702_v6, 0.0  ;;  %v1789_v17 = vpop.f32.mrb[3].mxu0  ;;  %v1953_v18 = vpop.f32.mrb[3].mxu1 }
 0x1eb   :  { %v1956_v19 = vmax.f32 %v2701_v10, 0.0  ;;  %v1958_v20 = vmax.f32 %v2703_v12, 0.0 }
 0x1ec   :  { %v1959_v21 = vmul.f32 %v1955_v15, %v321_v3  ;;  %v1961_v22 = vmul.f32 %v1957_v16, %v323_v5 }
 0x1ed   :  { %v1960_v23 = vmul.f32 %v1956_v19, %v322_v9  ;;  %v1962_v24 = vmul.f32 %v1958_v20, %v324_v11 }
 0x1ee   :  { %v1963_v25 = vmul.f32 1.1764706, %v1959_v21  ;;  %v1965_v26 = vmul.f32 1.1764706, %v1961_v22 }
 0x1ef   :  { %v1964_v27 = vmul.f32 1.1764706, %v1960_v23  ;;  %v1966_v28 = vmul.f32 1.1764706, %v1962_v24 }
 0x1f0   :  { %v1967_v31 = vpack.c.bf16 %v1963_v25, %v1963_v25  ;;  %v1969_v32 = vpack.c.bf16 %v1965_v26, %v1965_v26 }
 0x1f1   :  { %v1968_v29 = vpack.c.bf16 %v1964_v27, %v1964_v27  ;;  %v1970_v30 = vpack.c.bf16 %v1966_v28, %v1966_v28 }
 0x1f3   :  { %2266 = vmatprep.mubr.bf16.mxu0 %v1968_v29  ;;  %2306 = vmatprep.mubr.bf16.mxu1 %v1970_v30 }
 0x1f4   :  { %2267 = vmatmul.mubr.bf16.vlgmr.msra.gmra.mrb[4].mxu0 %v1967_v31  ;;  %2307 = vmatmul.mubr.bf16.vlgmr.msra.gmra.mrb[4].mxu1 %v1969_v32 }
 0x2c7   :  { %v2672_v33 = vpop.f32.mrb[4].mxu0  ;;  %v2694_v34 = vpop.f32.mrb[4].mxu1 }
 0x2c8   :  { %v2673_v36 = vpop.f32.mrb[5].mxu0  ;;  %v2695_v37 = vpop.f32.mrb[5].mxu1 }
 0x2c9   :  { %v2674_v38 = vadd.f32 %v2673_v36, %v2672_v33  ;;  %v2696_v39 = vadd.f32 %v2695_v37, %v2694_v34  ;;  %v2675_v40 = vpop.f32.mrb[6].mxu0  ;;  %v2697_v41 = vpop.f32.mrb[6].mxu1 }
 0x2ca   :  { %v2676_v42 = vpop.f32.mrb[7].mxu0  ;;  %v2698_v43 = vpop.f32.mrb[7].mxu1 }
 0x2cb   :  { %v2269_v44 = vadd.f32 %v2674_v38, %v2622_v35 }
 0x2cd   :  { %v2309_v45 = vadd.f32 %v2696_v39, %v2269_v44 }
 0x2cf   :  { %v2330_v46 = vmul.f32 %v2309_v45, %v2309_v45  ;;  %v2314_v47 = vmul.f32 1.442695, %v2309_v45 }
 0x2d1   :  { %2332 = vrot.lane.b32.xlu0 %v2330_v46, %s3203_s28  ;;  %3150 = vpow2.f32 %v2314_v47 }
 0x2db   :  { %v3151_v48 = vpop.eup %3150 }
 0x2dc   :  { %v2329_v49 = vmul.f32 %v3151_v48, %v3151_v48  ;;  %v2321_v55 = vmul.f32 %v3151_v48, %v2319_v54 }
 0x343   :  { %v2333_v50 = vpop.permute.xlu0 %2332 }
 0x344   :  { %v2335_v51 = vadd.f32 %v2333_v50, %v2329_v49 }
 0x346   :  { %v2336_v52 = vsub.f32 %v2335_v51, %v2309_v45 }
 0x348   :  { %v2655_v53 = vadd.f32 -0.5, %v2336_v52 }
 0x34a   :  { %2339 = vrot.lane.b32.xlu0 %v2655_v53, %s3204_s4 }
 0x34e   :  { %2323 = vrot.lane.b32.xlu0 %v2321_v55, %s3204_s4 }
 0x3bc   :  { %v2340_v56 = vpop.permute.xlu0 %2339 }
 0x3bd   :  { %v2342_v57 = vsel %vm2327_vm0, %v2340_v56, 0.0 }
 0x3be   :  { %2343 = vadd.xlane.f32.xlu1 %v2342_v57 }
 0x3c0   :  { %v2324_v58 = vpop.permute.xlu0 %2323 }
 0x3c1   :  { %v2326_v59 = vadd.f32 %v2324_v58, %v2309_v45 }
 0x3c3   :  { %2328 = vst.msk [vmem:[#allocation5] sm:$0xff] %vm2327_vm0, %v2326_v59 }
 0x3c4   :  { %3185 = shalt.err (!%p3182_p12)
}
 0x3c5   :  { %s3186_s14 = scalar_lea.hbm %s3419_s7, 128 }
 0x3c6   :  { %p3187_p13 = scmp.ne.s32.totalorder %s3419_s7, %s3186_s14  ;;  %p3190_p0 = scmp.lt.u32.totalorder %s3186_s14, %s3419_s7 }
 0x3c8   :  { %p3192_p1 = pnand %p3190_p0, %p3187_p13 }
 0x3ca   :  { %3195 = shalt.err (!%p3192_p1)
}
 0x3cb   :  { %2356 = dma.vmem_to_hbm [thread:$0]  %s2354_s10, 128, %s3419_s7, [#allocation4]   ;;  %vm2345_vm1 = vcmask 7168  }
 0x44b   :  { %v2344_v60 = vpop.xlane.xlu1 %2343 }
 0x44c   :  { %2346 = vst.msk [vmem:[%s3420_s8] sm:$0xff] %vm2345_vm1, %v2344_v60 }
 0x44d   :  { %3198 = dma.done.wait [#allocation4], 128  }
 0x44e   :  { %3199 = vsyncadd [#allocation4], 4294967168 }
 0x44f   :  { %2364 = vsyncpa [#allocation3], 1 }
 0x450   :  { %2365 = vsyncpa [#allocation4], 1 }

</bundles_post_ra>
